<compile_context>
chip_gen: v6e
topology: v6e:2x2x1
jax: 0.10.0
libtpu: 0.0.40
codegen_flags: <defaults>
</compile_context>

<pallas_src>
import functools

import jax
import jax.numpy as jnp
from jax.experimental import pallas as pl
from jax.experimental.pallas import tpu as pltpu

N_NODES = 32
INPUT_DIM = 16
HIDDEN_DIM = 16
HEADS = 4
NUM_LAYERS = 2
OUTPUT_DIM = 8
NEG_SLOPE = 0.2  # GATConv default negative_slope


def _full_spec(shape):
    # Whole array as a single block (grid=(1,)).
    return pl.BlockSpec(shape, lambda i: (0,) * len(shape))


# ----------------------------------------------------------------------------
# Fused kernel: all GAT layers + post_mp in one invocation.
# ----------------------------------------------------------------------------
def fused_gat_kernel(x_ref, adjb_ref, w_ref, att_ref, ms_ref, wp_ref, bp_ref,
                     out_ref, *, num_layers, heads, hidden, n_nodes):
    adj_bias = adjb_ref[...]                      # (H*N, N) additive mask, 0 / -1e30
    x = x_ref[...]                                # (N, F_max), stays in registers

    for l in range(num_layers):
        ms_l = ms_ref[l]                          # (heads+1, H*hid): masked scales + shift

        # Per-layer linear transform for ALL heads: (N, F_max) @ (F_max, H*hid)
        h = jnp.dot(x, w_ref[l], preferred_element_type=jnp.float32)

        # Source logits for all heads, already broadcast to the (H*N, N) stacking:
        #   src[hd*N + i, j] = sum_d att_src[hd, d] * h[j, hd*hid + d]
        src = jax.lax.dot_general(att_ref[2 * l], h, (((1,), (1,)), ((), ())),
                                  preferred_element_type=jnp.float32)     # (H*N, N)

        # Target logits for all heads as a (H*N, 1) column: VPU mul + XLU lane reduce
        h_tiled = jnp.concatenate([h] * heads, axis=0)                     # (H*N, H*hid)
        dst = jnp.sum(h_tiled * att_ref[2 * l + 1], axis=1, keepdims=True)  # (H*N, 1)

        # Batched (all heads at once) masked softmax over source nodes j.
        e = dst + src                                                      # (H*N, N)
        e = jnp.where(e > 0.0, e, NEG_SLOPE * e) + adj_bias                # LeakyReLU + mask
        m = jnp.max(e, axis=1, keepdims=True)                              # finite: self-loops
        p = jnp.exp(e - m)                       # masked entries underflow to exactly 0.0
        s = jnp.sum(p, axis=1, keepdims=True)    # >= 1 thanks to self-loops
        attn = p * pl.reciprocal(s, approx=True)                           # (H*N, N)

        # Aggregation for all heads in ONE matmul; per-head lane mask + BN scale are
        # pre-folded into ms_l[hd], conv bias + BN shift into ms_l[heads].
        z = jnp.dot(attn, h, preferred_element_type=jnp.float32)           # (H*N, H*hid)
        y = ms_l[heads]
        for hd in range(heads):
            y = y + z[hd * n_nodes:(hd + 1) * n_nodes, :] * ms_l[hd]
        x = jnp.maximum(y, 0.0)                   # ReLU; dropout = identity (inference)

    # post_mp folded to a single Linear: x @ (w1 @ w2) + (b1 @ w2 + b2)
    out_ref[...] = jnp.dot(x, wp_ref[...], preferred_element_type=jnp.float32) + bp_ref[...]


# ----------------------------------------------------------------------------
# Wrapper: one-time parameter folding + single pallas_call.
# ----------------------------------------------------------------------------
def gat_forward(x, adj, layer_params, w1, b1, w2, b2, *, heads, hidden):
    n, f_in = x.shape
    f_out = heads * hidden
    num_layers = len(layer_params)
    assert f_in <= f_out, "layer-0 input dim must fit the padded feature width"
    f_max = f_out

    # Pad layer-0 features to the uniform width (zero columns, exact result).
    x_pad = jnp.zeros((n, f_max), jnp.float32).at[:, :f_in].set(x)

    # Additive edge mask (0 at edges, -1e30 at non-edges), tiled per head along sublanes.
    adjb_tiled = jnp.tile((adj - 1.0) * 1e30, (heads, 1))                  # (H*N, N)

    # Stacked per-layer weights (layer-0 W zero-padded along rows -> exact).
    w_all = []
    for p in layer_params:
        w = p["w"]
        w_all.append(jnp.zeros((f_max, f_out), jnp.float32).at[:w.shape[0], :].set(w))
    w_all = jnp.stack(w_all)                                               # (L, F_max, H*hid)

    # Block-structured attention constants:
    #   src_expand[hd*N + i, hd*hid + d] = att_src[hd, d]   (else 0)
    #   dst_expand[hd*N + i, hd*hid + d] = att_dst[hd, d]   (else 0)
    att_all = []
    for p in layer_params:
        src_e = jnp.zeros((heads * n, f_out), jnp.float32)
        dst_e = jnp.zeros((heads * n, f_out), jnp.float32)
        for hd in range(heads):
            rows, cols = slice(hd * n, (hd + 1) * n), slice(hd * hidden, (hd + 1) * hidden)
            src_e = src_e.at[rows, cols].set(jnp.broadcast_to(p["att_src"][hd], (n, hidden)))
            dst_e = dst_e.at[rows, cols].set(jnp.broadcast_to(p["att_dst"][hd], (n, hidden)))
        att_all.append(src_e)
        att_all.append(dst_e)
    att_all = jnp.stack(att_all)                                           # (2L, H*N, H*hid)

    # Per-layer epilogue constants: rows 0..H-1 = per-head lane mask * BN scale,
    # row H = conv-bias-folded BN shift.
    ms_all = []
    for p in layer_params:
        scale = p["scale"].reshape(f_out)
        shift_folded = (p["bias"] * p["scale"] + p["shift"]).reshape(f_out)
        rows = []
        for hd in range(heads):
            mask = jnp.zeros((f_out,), jnp.float32).at[hd * hidden:(hd + 1) * hidden].set(1.0)
            rows.append(mask * scale)
        rows.append(shift_folded)
        ms_all.append(jnp.stack(rows))
    ms_all = jnp.stack(ms_all)                                             # (L, H+1, H*hid)

    # post_mp fold (dropout is identity at inference -> two Linears collapse to one).
    wp = w1 @ w2                                                           # (H*hid, out)
    bp = b1 @ w2 + b2                                                      # (1, out)

    ops = [x_pad, adjb_tiled, w_all, att_all, ms_all, wp, bp]
    out_dim = w2.shape[1]
    kern = functools.partial(fused_gat_kernel, num_layers=num_layers,
                             heads=heads, hidden=hidden, n_nodes=n)
    return pl.pallas_call(
        kern,
        out_shape=jax.ShapeDtypeStruct((n, out_dim), jnp.float32),
        grid=(1,),
        in_specs=[_full_spec(o.shape) for o in ops],
        out_specs=_full_spec((n, out_dim)),
        compiler_params=pltpu.CompilerParams(dimension_semantics=("arbitrary",)),
    )(*ops)


# ----------------------------------------------------------------------------
# Pure-JAX reference (independent math, used for correctness check).
# ----------------------------------------------------------------------------
def ref_gat_layer(x, adj, w, att_src, att_dst, bias, scale, shift, heads, hidden):
    n = x.shape[0]
    h = x @ w
    hh = h.reshape(n, heads, hidden)
    a_s = jnp.einsum('nhd,hd->nh', hh, att_src)
    a_d = jnp.einsum('nhd,hd->nh', hh, att_dst)
    e = a_d[:, None, :] + a_s[None, :, :]        # (i, j, head)
    e = jnp.where(e > 0, e, NEG_SLOPE * e)
    mask = (adj > 0)[:, :, None]
    e = jnp.where(mask, e, -1e30)
    m = e.max(axis=1, keepdims=True)
    p = jnp.where(mask, jnp.exp(e - m), 0.0)
    s = p.sum(axis=1, keepdims=True)
    attn = p * jnp.where(s > 0, 1.0 / s, 0.0)
    out = jnp.einsum('ijh,jhd->ihd', attn, hh).reshape(n, heads * hidden)
    out = (out + bias) * scale + shift
    return jnp.maximum(out, 0.0)


if __name__ == "__main__":
    key = jax.random.PRNGKey(0)
    n, f_out = N_NODES, HEADS * HIDDEN_DIM

    # Inputs
    key, kx, ka = jax.random.split(key, 3)
    x = jax.random.normal(kx, (n, INPUT_DIM), jnp.float32)
    adj = (jax.random.uniform(ka, (n, n)) < 0.2).astype(jnp.float32)
    adj = jnp.maximum(adj, jnp.eye(n, dtype=jnp.float32))  # add self loops

    # Per-layer parameters (deterministic, synthetic); BN uses eval running stats.
    layer_params = []
    in_dim = INPUT_DIM
    for _ in range(NUM_LAYERS):
        key, kw, ks, kd, kb, kg, kbt, km, kv = jax.random.split(key, 9)
        w = jax.random.normal(kw, (in_dim, f_out), jnp.float32) * 0.2
        att_src = jax.random.normal(ks, (HEADS, HIDDEN_DIM), jnp.float32) * 0.2
        att_dst = jax.random.normal(kd, (HEADS, HIDDEN_DIM), jnp.float32) * 0.2
        bias = jax.random.normal(kb, (1, f_out), jnp.float32) * 0.1
        gamma = 1.0 + 0.1 * jax.random.normal(kg, (1, f_out), jnp.float32)
        beta = 0.1 * jax.random.normal(kbt, (1, f_out), jnp.float32)
        run_mean = 0.1 * jax.random.normal(km, (1, f_out), jnp.float32)
        run_var = 1.0 + 0.1 * jnp.abs(jax.random.normal(kv, (1, f_out), jnp.float32))
        inv_std = 1.0 / jnp.sqrt(run_var + 1e-5)
        scale = gamma * inv_std
        shift = beta - run_mean * scale
        layer_params.append(dict(w=w, att_src=att_src, att_dst=att_dst,
                                 bias=bias, scale=scale, shift=shift))
        in_dim = f_out

    # post_mp parameters
    key, k1, k2, k3, k4 = jax.random.split(key, 5)
    w1 = jax.random.normal(k1, (f_out, HIDDEN_DIM), jnp.float32) * 0.2
    b1 = jax.random.normal(k2, (1, HIDDEN_DIM), jnp.float32) * 0.1
    w2 = jax.random.normal(k3, (HIDDEN_DIM, OUTPUT_DIM), jnp.float32) * 0.2
    b2 = jax.random.normal(k4, (1, OUTPUT_DIM), jnp.float32) * 0.1

    # Fused Pallas forward (single kernel launch)
    out = gat_forward(x, adj, layer_params, w1, b1, w2, b2,
                      heads=HEADS, hidden=HIDDEN_DIM)
    out = jax.block_until_ready(out)

    # Reference forward
    hr = x
    for p in layer_params:
        hr = ref_gat_layer(hr, adj, p["w"], p["att_src"], p["att_dst"],
                           p["bias"], p["scale"], p["shift"], HEADS, HIDDEN_DIM)
    out_ref = (hr @ w1 + b1) @ w2 + b2

    assert out.shape == (N_NODES, OUTPUT_DIM)
    # slightly looser tolerance to accommodate the approximate (EUP) reciprocal
    assert jnp.allclose(out, out_ref, rtol=2e-3, atol=2e-3), "Pallas output mismatch"
    print("KERNEL_OK")
</pallas_src>

<mosaic_0001>
module attributes {stable_mosaic.version = 11 : i64} {
  func.func @fused_gat_kernel(%arg0: i32, %arg1: memref<32x64xf32, #tpu.memory_space<vmem>>, %arg2: memref<128x32xf32, #tpu.memory_space<vmem>>, %arg3: memref<2x64x64xf32, #tpu.memory_space<vmem>>, %arg4: memref<4x128x64xf32, #tpu.memory_space<vmem>>, %arg5: memref<2x5x64xf32, #tpu.memory_space<vmem>>, %arg6: memref<64x8xf32, #tpu.memory_space<vmem>>, %arg7: memref<1x8xf32, #tpu.memory_space<vmem>>, %arg8: memref<32x8xf32, #tpu.memory_space<vmem>>) attributes {dimension_semantics = [#tpu.dimension_semantics<arbitrary>], iteration_bounds = array<i64: 1>, scalar_prefetch = 0 : i64, scratch_operands = 0 : i64, tpu.core_type = #tpu.core_type<tc>, window_params = [{pipeline_mode = #tpu.pipeline_mode<synchronous>, transform_indices = @transform_0, window_bounds = array<i64: 32, 64>}, {pipeline_mode = #tpu.pipeline_mode<synchronous>, transform_indices = @transform_1, window_bounds = array<i64: 128, 32>}, {pipeline_mode = #tpu.pipeline_mode<synchronous>, transform_indices = @transform_2, window_bounds = array<i64: 2, 64, 64>}, {pipeline_mode = #tpu.pipeline_mode<synchronous>, transform_indices = @transform_3, window_bounds = array<i64: 4, 128, 64>}, {pipeline_mode = #tpu.pipeline_mode<synchronous>, transform_indices = @transform_4, window_bounds = array<i64: 2, 5, 64>}, {pipeline_mode = #tpu.pipeline_mode<synchronous>, transform_indices = @transform_5, window_bounds = array<i64: 64, 8>}, {pipeline_mode = #tpu.pipeline_mode<synchronous>, transform_indices = @transform_6, window_bounds = array<i64: 1, 8>}, {pipeline_mode = #tpu.pipeline_mode<synchronous>, transform_indices = @transform_7, window_bounds = array<i64: 32, 8>}]} {
    %c0 = arith.constant 0 : index
    %c0_0 = arith.constant 0 : index
    %0 = vector.load %arg2[%c0, %c0_0] : memref<128x32xf32, #tpu.memory_space<vmem>>, vector<128x32xf32>
    %c0_1 = arith.constant 0 : index
    %c0_2 = arith.constant 0 : index
    %1 = vector.load %arg1[%c0_1, %c0_2] : memref<32x64xf32, #tpu.memory_space<vmem>>, vector<32x64xf32>
    %c0_3 = arith.constant 0 : index
    %c0_4 = arith.constant 0 : index
    %c0_5 = arith.constant 0 : index
    %2 = vector.load %arg5[%c0_3, %c0_4, %c0_5] : memref<2x5x64xf32, #tpu.memory_space<vmem>>, vector<1x5x64xf32>
    %3 = vector.shape_cast %2 : vector<1x5x64xf32> to vector<5x64xf32>
    %c0_6 = arith.constant 0 : index
    %c0_7 = arith.constant 0 : index
    %c0_8 = arith.constant 0 : index
    %4 = vector.load %arg3[%c0_6, %c0_7, %c0_8] : memref<2x64x64xf32, #tpu.memory_space<vmem>>, vector<1x64x64xf32>
    %5 = vector.shape_cast %4 : vector<1x64x64xf32> to vector<64x64xf32>
    %cst = arith.constant dense<0.000000e+00> : vector<32x64xf32>
    %6 = tpu.matmul %1, %5, %cst {dimension_numbers = #tpu.dot_dimension_numbers<[1], [0], [0], [1], [0, 0, 1, 1], [], []>} : vector<32x64xf32>, vector<64x64xf32>, vector<32x64xf32> -> vector<32x64xf32>
    %c0_9 = arith.constant 0 : index
    %c0_10 = arith.constant 0 : index
    %c0_11 = arith.constant 0 : index
    %7 = vector.load %arg4[%c0_9, %c0_10, %c0_11] : memref<4x128x64xf32, #tpu.memory_space<vmem>>, vector<1x128x64xf32>
    %8 = vector.shape_cast %7 : vector<1x128x64xf32> to vector<128x64xf32>
    %cst_12 = arith.constant dense<0.000000e+00> : vector<128x32xf32>
    %9 = tpu.matmul %8, %6, %cst_12 {dimension_numbers = #tpu.dot_dimension_numbers<[1], [1], [0], [0], [0, 0, 1, 0], [], []>} : vector<128x64xf32>, vector<32x64xf32>, vector<128x32xf32> -> vector<128x32xf32>
    %10 = tpu.concatenate %6, %6, %6, %6 in 0 : vector<32x64xf32>, vector<32x64xf32>, vector<32x64xf32>, vector<32x64xf32> -> vector<128x64xf32>
    %c1 = arith.constant 1 : index
    %c0_13 = arith.constant 0 : index
    %c0_14 = arith.constant 0 : index
    %11 = vector.load %arg4[%c1, %c0_13, %c0_14] : memref<4x128x64xf32, #tpu.memory_space<vmem>>, vector<1x128x64xf32>
    %12 = vector.shape_cast %11 : vector<1x128x64xf32> to vector<128x64xf32>
    %13 = arith.mulf %10, %12 : vector<128x64xf32>
    %cst_15 = arith.constant dense<0.000000e+00> : vector<128xf32>
    %14 = vector.multi_reduction <add>, %13, %cst_15 [1] : vector<128x64xf32> to vector<128xf32>
    %15 = vector.shape_cast %14 : vector<128xf32> to vector<128x1xf32>
    %16 = vector.broadcast %15 : vector<128x1xf32> to vector<128x32xf32>
    %17 = arith.addf %16, %9 : vector<128x32xf32>
    %cst_16 = arith.constant 0.000000e+00 : f32
    %18 = vector.broadcast %cst_16 : f32 to vector<128x32xf32>
    %19 = arith.cmpf ogt, %17, %18 : vector<128x32xf32>
    %cst_17 = arith.constant 2.000000e-01 : f32
    %20 = vector.broadcast %cst_17 : f32 to vector<128x32xf32>
    %21 = arith.mulf %20, %17 : vector<128x32xf32>
    %22 = arith.select %19, %17, %21 : vector<128x32xi1>, vector<128x32xf32>
    %23 = arith.addf %22, %0 : vector<128x32xf32>
    %cst_18 = arith.constant dense<0xFF800000> : vector<128xf32>
    %24 = vector.multi_reduction <maximumf>, %23, %cst_18 [1] : vector<128x32xf32> to vector<128xf32>
    %25 = vector.shape_cast %24 : vector<128xf32> to vector<128x1xf32>
    %26 = vector.broadcast %25 : vector<128x1xf32> to vector<128x32xf32>
    %27 = arith.subf %23, %26 : vector<128x32xf32>
    %28 = math.exp %27 : vector<128x32xf32>
    %cst_19 = arith.constant dense<0.000000e+00> : vector<128xf32>
    %29 = vector.multi_reduction <add>, %28, %cst_19 [1] : vector<128x32xf32> to vector<128xf32>
    %30 = vector.shape_cast %29 : vector<128xf32> to vector<128x1xf32>
    %31 = tpu.reciprocal %30 {approx = true} : vector<128x1xf32> -> vector<128x1xf32>
    %32 = vector.broadcast %31 : vector<128x1xf32> to vector<128x32xf32>
    %33 = arith.mulf %28, %32 : vector<128x32xf32>
    %cst_20 = arith.constant dense<0.000000e+00> : vector<128x64xf32>
    %34 = tpu.matmul %33, %6, %cst_20 {dimension_numbers = #tpu.dot_dimension_numbers<[1], [0], [0], [1], [0, 0, 1, 1], [], []>} : vector<128x32xf32>, vector<32x64xf32>, vector<128x64xf32> -> vector<128x64xf32>
    %35 = vector.extract_strided_slice %3 {offsets = [4, 0], sizes = [1, 64], strides = [1, 1]} : vector<5x64xf32> to vector<1x64xf32>
    %36 = vector.shape_cast %35 : vector<1x64xf32> to vector<64xf32>
    %37 = vector.extract_strided_slice %34 {offsets = [0, 0], sizes = [32, 64], strides = [1, 1]} : vector<128x64xf32> to vector<32x64xf32>
    %38 = vector.extract_strided_slice %3 {offsets = [0, 0], sizes = [1, 64], strides = [1, 1]} : vector<5x64xf32> to vector<1x64xf32>
    %39 = vector.shape_cast %38 : vector<1x64xf32> to vector<64xf32>
    %40 = vector.shape_cast %39 : vector<64xf32> to vector<1x64xf32>
    %41 = vector.broadcast %40 : vector<1x64xf32> to vector<32x64xf32>
    %42 = arith.mulf %37, %41 : vector<32x64xf32>
    %43 = vector.shape_cast %36 : vector<64xf32> to vector<1x64xf32>
    %44 = vector.broadcast %43 : vector<1x64xf32> to vector<32x64xf32>
    %45 = arith.addf %44, %42 : vector<32x64xf32>
    %46 = vector.extract_strided_slice %34 {offsets = [32, 0], sizes = [32, 64], strides = [1, 1]} : vector<128x64xf32> to vector<32x64xf32>
    %47 = vector.extract_strided_slice %3 {offsets = [1, 0], sizes = [1, 64], strides = [1, 1]} : vector<5x64xf32> to vector<1x64xf32>
    %48 = vector.shape_cast %47 : vector<1x64xf32> to vector<64xf32>
    %49 = vector.shape_cast %48 : vector<64xf32> to vector<1x64xf32>
    %50 = vector.broadcast %49 : vector<1x64xf32> to vector<32x64xf32>
    %51 = arith.mulf %46, %50 : vector<32x64xf32>
    %52 = arith.addf %45, %51 : vector<32x64xf32>
    %53 = vector.extract_strided_slice %34 {offsets = [64, 0], sizes = [32, 64], strides = [1, 1]} : vector<128x64xf32> to vector<32x64xf32>
    %54 = vector.extract_strided_slice %3 {offsets = [2, 0], sizes = [1, 64], strides = [1, 1]} : vector<5x64xf32> to vector<1x64xf32>
    %55 = vector.shape_cast %54 : vector<1x64xf32> to vector<64xf32>
    %56 = vector.shape_cast %55 : vector<64xf32> to vector<1x64xf32>
    %57 = vector.broadcast %56 : vector<1x64xf32> to vector<32x64xf32>
    %58 = arith.mulf %53, %57 : vector<32x64xf32>
    %59 = arith.addf %52, %58 : vector<32x64xf32>
    %60 = vector.extract_strided_slice %34 {offsets = [96, 0], sizes = [32, 64], strides = [1, 1]} : vector<128x64xf32> to vector<32x64xf32>
    %61 = vector.extract_strided_slice %3 {offsets = [3, 0], sizes = [1, 64], strides = [1, 1]} : vector<5x64xf32> to vector<1x64xf32>
    %62 = vector.shape_cast %61 : vector<1x64xf32> to vector<64xf32>
    %63 = vector.shape_cast %62 : vector<64xf32> to vector<1x64xf32>
    %64 = vector.broadcast %63 : vector<1x64xf32> to vector<32x64xf32>
    %65 = arith.mulf %60, %64 : vector<32x64xf32>
    %66 = arith.addf %59, %65 : vector<32x64xf32>
    %cst_21 = arith.constant 0.000000e+00 : f32
    %67 = vector.broadcast %cst_21 : f32 to vector<32x64xf32>
    %68 = arith.maximumf %66, %67 : vector<32x64xf32>
    %c1_22 = arith.constant 1 : index
    %c0_23 = arith.constant 0 : index
    %c0_24 = arith.constant 0 : index
    %69 = vector.load %arg5[%c1_22, %c0_23, %c0_24] : memref<2x5x64xf32, #tpu.memory_space<vmem>>, vector<1x5x64xf32>
    %70 = vector.shape_cast %69 : vector<1x5x64xf32> to vector<5x64xf32>
    %c1_25 = arith.constant 1 : index
    %c0_26 = arith.constant 0 : index
    %c0_27 = arith.constant 0 : index
    %71 = vector.load %arg3[%c1_25, %c0_26, %c0_27] : memref<2x64x64xf32, #tpu.memory_space<vmem>>, vector<1x64x64xf32>
    %72 = vector.shape_cast %71 : vector<1x64x64xf32> to vector<64x64xf32>
    %cst_28 = arith.constant dense<0.000000e+00> : vector<32x64xf32>
    %73 = tpu.matmul %68, %72, %cst_28 {dimension_numbers = #tpu.dot_dimension_numbers<[1], [0], [0], [1], [0, 0, 1, 1], [], []>} : vector<32x64xf32>, vector<64x64xf32>, vector<32x64xf32> -> vector<32x64xf32>
    %c2 = arith.constant 2 : index
    %c0_29 = arith.constant 0 : index
    %c0_30 = arith.constant 0 : index
    %74 = vector.load %arg4[%c2, %c0_29, %c0_30] : memref<4x128x64xf32, #tpu.memory_space<vmem>>, vector<1x128x64xf32>
    %75 = vector.shape_cast %74 : vector<1x128x64xf32> to vector<128x64xf32>
    %cst_31 = arith.constant dense<0.000000e+00> : vector<128x32xf32>
    %76 = tpu.matmul %75, %73, %cst_31 {dimension_numbers = #tpu.dot_dimension_numbers<[1], [1], [0], [0], [0, 0, 1, 0], [], []>} : vector<128x64xf32>, vector<32x64xf32>, vector<128x32xf32> -> vector<128x32xf32>
    %77 = tpu.concatenate %73, %73, %73, %73 in 0 : vector<32x64xf32>, vector<32x64xf32>, vector<32x64xf32>, vector<32x64xf32> -> vector<128x64xf32>
    %c3 = arith.constant 3 : index
    %c0_32 = arith.constant 0 : index
    %c0_33 = arith.constant 0 : index
    %78 = vector.load %arg4[%c3, %c0_32, %c0_33] : memref<4x128x64xf32, #tpu.memory_space<vmem>>, vector<1x128x64xf32>
    %79 = vector.shape_cast %78 : vector<1x128x64xf32> to vector<128x64xf32>
    %80 = arith.mulf %77, %79 : vector<128x64xf32>
    %cst_34 = arith.constant dense<0.000000e+00> : vector<128xf32>
    %81 = vector.multi_reduction <add>, %80, %cst_34 [1] : vector<128x64xf32> to vector<128xf32>
    %82 = vector.shape_cast %81 : vector<128xf32> to vector<128x1xf32>
    %83 = vector.broadcast %82 : vector<128x1xf32> to vector<128x32xf32>
    %84 = arith.addf %83, %76 : vector<128x32xf32>
    %cst_35 = arith.constant 0.000000e+00 : f32
    %85 = vector.broadcast %cst_35 : f32 to vector<128x32xf32>
    %86 = arith.cmpf ogt, %84, %85 : vector<128x32xf32>
    %cst_36 = arith.constant 2.000000e-01 : f32
    %87 = vector.broadcast %cst_36 : f32 to vector<128x32xf32>
    %88 = arith.mulf %87, %84 : vector<128x32xf32>
    %89 = arith.select %86, %84, %88 : vector<128x32xi1>, vector<128x32xf32>
    %90 = arith.addf %89, %0 : vector<128x32xf32>
    %cst_37 = arith.constant dense<0xFF800000> : vector<128xf32>
    %91 = vector.multi_reduction <maximumf>, %90, %cst_37 [1] : vector<128x32xf32> to vector<128xf32>
    %92 = vector.shape_cast %91 : vector<128xf32> to vector<128x1xf32>
    %93 = vector.broadcast %92 : vector<128x1xf32> to vector<128x32xf32>
    %94 = arith.subf %90, %93 : vector<128x32xf32>
    %95 = math.exp %94 : vector<128x32xf32>
    %cst_38 = arith.constant dense<0.000000e+00> : vector<128xf32>
    %96 = vector.multi_reduction <add>, %95, %cst_38 [1] : vector<128x32xf32> to vector<128xf32>
    %97 = vector.shape_cast %96 : vector<128xf32> to vector<128x1xf32>
    %98 = tpu.reciprocal %97 {approx = true} : vector<128x1xf32> -> vector<128x1xf32>
    %99 = vector.broadcast %98 : vector<128x1xf32> to vector<128x32xf32>
    %100 = arith.mulf %95, %99 : vector<128x32xf32>
    %cst_39 = arith.constant dense<0.000000e+00> : vector<128x64xf32>
    %101 = tpu.matmul %100, %73, %cst_39 {dimension_numbers = #tpu.dot_dimension_numbers<[1], [0], [0], [1], [0, 0, 1, 1], [], []>} : vector<128x32xf32>, vector<32x64xf32>, vector<128x64xf32> -> vector<128x64xf32>
    %102 = vector.extract_strided_slice %70 {offsets = [4, 0], sizes = [1, 64], strides = [1, 1]} : vector<5x64xf32> to vector<1x64xf32>
    %103 = vector.shape_cast %102 : vector<1x64xf32> to vector<64xf32>
    %104 = vector.extract_strided_slice %101 {offsets = [0, 0], sizes = [32, 64], strides = [1, 1]} : vector<128x64xf32> to vector<32x64xf32>
    %105 = vector.extract_strided_slice %70 {offsets = [0, 0], sizes = [1, 64], strides = [1, 1]} : vector<5x64xf32> to vector<1x64xf32>
    %106 = vector.shape_cast %105 : vector<1x64xf32> to vector<64xf32>
    %107 = vector.shape_cast %106 : vector<64xf32> to vector<1x64xf32>
    %108 = vector.broadcast %107 : vector<1x64xf32> to vector<32x64xf32>
    %109 = arith.mulf %104, %108 : vector<32x64xf32>
    %110 = vector.shape_cast %103 : vector<64xf32> to vector<1x64xf32>
    %111 = vector.broadcast %110 : vector<1x64xf32> to vector<32x64xf32>
    %112 = arith.addf %111, %109 : vector<32x64xf32>
    %113 = vector.extract_strided_slice %101 {offsets = [32, 0], sizes = [32, 64], strides = [1, 1]} : vector<128x64xf32> to vector<32x64xf32>
    %114 = vector.extract_strided_slice %70 {offsets = [1, 0], sizes = [1, 64], strides = [1, 1]} : vector<5x64xf32> to vector<1x64xf32>
    %115 = vector.shape_cast %114 : vector<1x64xf32> to vector<64xf32>
    %116 = vector.shape_cast %115 : vector<64xf32> to vector<1x64xf32>
    %117 = vector.broadcast %116 : vector<1x64xf32> to vector<32x64xf32>
    %118 = arith.mulf %113, %117 : vector<32x64xf32>
    %119 = arith.addf %112, %118 : vector<32x64xf32>
    %120 = vector.extract_strided_slice %101 {offsets = [64, 0], sizes = [32, 64], strides = [1, 1]} : vector<128x64xf32> to vector<32x64xf32>
    %121 = vector.extract_strided_slice %70 {offsets = [2, 0], sizes = [1, 64], strides = [1, 1]} : vector<5x64xf32> to vector<1x64xf32>
    %122 = vector.shape_cast %121 : vector<1x64xf32> to vector<64xf32>
    %123 = vector.shape_cast %122 : vector<64xf32> to vector<1x64xf32>
    %124 = vector.broadcast %123 : vector<1x64xf32> to vector<32x64xf32>
    %125 = arith.mulf %120, %124 : vector<32x64xf32>
    %126 = arith.addf %119, %125 : vector<32x64xf32>
    %127 = vector.extract_strided_slice %101 {offsets = [96, 0], sizes = [32, 64], strides = [1, 1]} : vector<128x64xf32> to vector<32x64xf32>
    %128 = vector.extract_strided_slice %70 {offsets = [3, 0], sizes = [1, 64], strides = [1, 1]} : vector<5x64xf32> to vector<1x64xf32>
    %129 = vector.shape_cast %128 : vector<1x64xf32> to vector<64xf32>
    %130 = vector.shape_cast %129 : vector<64xf32> to vector<1x64xf32>
    %131 = vector.broadcast %130 : vector<1x64xf32> to vector<32x64xf32>
    %132 = arith.mulf %127, %131 : vector<32x64xf32>
    %133 = arith.addf %126, %132 : vector<32x64xf32>
    %cst_40 = arith.constant 0.000000e+00 : f32
    %134 = vector.broadcast %cst_40 : f32 to vector<32x64xf32>
    %135 = arith.maximumf %133, %134 : vector<32x64xf32>
    %c0_41 = arith.constant 0 : index
    %c0_42 = arith.constant 0 : index
    %136 = vector.load %arg6[%c0_41, %c0_42] : memref<64x8xf32, #tpu.memory_space<vmem>>, vector<64x8xf32>
    %cst_43 = arith.constant dense<0.000000e+00> : vector<32x8xf32>
    %137 = tpu.matmul %135, %136, %cst_43 {dimension_numbers = #tpu.dot_dimension_numbers<[1], [0], [0], [1], [0, 0, 1, 1], [], []>} : vector<32x64xf32>, vector<64x8xf32>, vector<32x8xf32> -> vector<32x8xf32>
    %c0_44 = arith.constant 0 : index
    %c0_45 = arith.constant 0 : index
    %138 = vector.load %arg7[%c0_44, %c0_45] : memref<1x8xf32, #tpu.memory_space<vmem>>, vector<1x8xf32>
    %139 = vector.broadcast %138 : vector<1x8xf32> to vector<32x8xf32>
    %140 = arith.addf %137, %139 : vector<32x8xf32>
    %c0_46 = arith.constant 0 : index
    %c0_47 = arith.constant 0 : index
    %141 = vector.load %arg8[%c0_46, %c0_47] : memref<32x8xf32, #tpu.memory_space<vmem>>, vector<32x8xf32>
    tpu.vector_store %arg8[%c0_46, %c0_47], %140 {strides = array<i32>} : memref<32x8xf32, #tpu.memory_space<vmem>>, vector<32x8xf32>,
    return
  }
  func.func @transform_0(%arg0: i32) -> (i32, i32) {
    %c0_i32 = arith.constant 0 : i32
    %c0_i32_0 = arith.constant 0 : i32
    %c0_i32_1 = arith.constant 0 : i32
    return %c0_i32, %c0_i32_0 : i32, i32
  }
  func.func @transform_1(%arg0: i32) -> (i32, i32) {
    %c0_i32 = arith.constant 0 : i32
    %c0_i32_0 = arith.constant 0 : i32
    %c0_i32_1 = arith.constant 0 : i32
    return %c0_i32, %c0_i32_0 : i32, i32
  }
  func.func @transform_2(%arg0: i32) -> (i32, i32, i32) {
    %c0_i32 = arith.constant 0 : i32
    %c0_i32_0 = arith.constant 0 : i32
    %c0_i32_1 = arith.constant 0 : i32
    %c0_i32_2 = arith.constant 0 : i32
    return %c0_i32, %c0_i32_0, %c0_i32_1 : i32, i32, i32
  }
  func.func @transform_3(%arg0: i32) -> (i32, i32, i32) {
    %c0_i32 = arith.constant 0 : i32
    %c0_i32_0 = arith.constant 0 : i32
    %c0_i32_1 = arith.constant 0 : i32
    %c0_i32_2 = arith.constant 0 : i32
    return %c0_i32, %c0_i32_0, %c0_i32_1 : i32, i32, i32
  }
  func.func @transform_4(%arg0: i32) -> (i32, i32, i32) {
    %c0_i32 = arith.constant 0 : i32
    %c0_i32_0 = arith.constant 0 : i32
    %c0_i32_1 = arith.constant 0 : i32
    %c0_i32_2 = arith.constant 0 : i32
    return %c0_i32, %c0_i32_0, %c0_i32_1 : i32, i32, i32
  }
  func.func @transform_5(%arg0: i32) -> (i32, i32) {
    %c0_i32 = arith.constant 0 : i32
    %c0_i32_0 = arith.constant 0 : i32
    %c0_i32_1 = arith.constant 0 : i32
    return %c0_i32, %c0_i32_0 : i32, i32
  }
  func.func @transform_6(%arg0: i32) -> (i32, i32) {
    %c0_i32 = arith.constant 0 : i32
    %c0_i32_0 = arith.constant 0 : i32
    %c0_i32_1 = arith.constant 0 : i32
    return %c0_i32, %c0_i32_0 : i32, i32
  }
  func.func @transform_7(%arg0: i32) -> (i32, i32) {
    %c0_i32 = arith.constant 0 : i32
    %c0_i32_0 = arith.constant 0 : i32
    %c0_i32_1 = arith.constant 0 : i32
    return %c0_i32, %c0_i32_0 : i32, i32
  }
}

</mosaic_0001>

<bundles_post_ra>
// kernel: tpu_custom_call.1
= control target key start
LH: loop header
LB: loop body
LE: loop exit
PB: predicated region body
PF: predicated region fallthrough
CT: control target
= control target key end

     0   :  { %vm55_vm0 = vcmask 523264   ;;  %vm535_vm2 = vcmask 261120   ;;  %s3594_s2 = inlined_call_operand.vmem [shape: f32[2,64,64], index: 2, kind: input, shape index: {}]   ;;  %s3595_s0 = inlined_call_operand.vmem [shape: f32[32,64], index: 0, kind: input, shape index: {}]   ;;  %s3596_s3 = inlined_call_operand.vmem [shape: f32[4,128,64], index: 3, kind: input, shape index: {}]   ;;  %s3597_s1 = inlined_call_operand.vmem [shape: f32[128,32], index: 1, kind: input, shape index: {}]   ;;  %s3598_s4 = inlined_call_operand.vmem [shape: f32[2,5,64], index: 4, kind: input, shape index: {}]   ;;  %s3599_s5 = inlined_call_operand.vmem [shape: f32[64,8], index: 5, kind: input, shape index: {}]   ;;  %s3600_s6 = inlined_call_operand.vmem [shape: f32[1,8], index: 6, kind: input, shape index: {}]   ;;  %s3601_s7 = inlined_call_operand.vmem [shape: f32[32,8], index: 7, kind: output, shape index: {}]  }
   0x1   :  { %v54_v0 = vld [vmem:[%s3594_s2 + $0x38] sm:$0xff]  ;;  %v53_v1 = vld [vmem:[%s3594_s2 + $0x30] sm:$0xff]  ;;  %v52_v2 = vld [vmem:[%s3594_s2 + $0x28] sm:$0xff] }
   0x2   :  { %2256 = vmatprep.subr.mxu0 %v54_v0  ;;  %v42_v3 = vld [vmem:[%s3595_s0] sm:$0xff]  ;;  %v50_v5 = vld [vmem:[%s3594_s2 + $0x18] sm:$0xff]  ;;  %v49_v6 = vld [vmem:[%s3594_s2 + $0x10] sm:$0xff] }
   0x3   :  { %2257 = vmatpush3.msra.mxu0 %v54_v0  ;;  %2272 = vmatprep.mubr.msk.f32.mxu0 %vm55_vm0, %v42_v3  ;;  %v51_v4 = vld [vmem:[%s3594_s2 + $0x20] sm:$0xff]  ;;  %v48_v7 = vld [vmem:[%s3594_s2 + $0x8] sm:$0xff]  ;;  %v44_v10 = vld [vmem:[%s3595_s0 + $0x10] sm:$0xff] }
   0x4   :  { %2258 = vmatprep.subr.mxu0 %v53_v1  ;;  %v47_v8 = vld [vmem:[%s3594_s2] sm:$0xff]  ;;  %v43_v9 = vld [vmem:[%s3595_s0 + $0x8] sm:$0xff]  ;;  %v45_v11 = vld [vmem:[%s3595_s0 + $0x18] sm:$0xff] }
   0x5   :  { %2259 = vmatpush3.msra.mxu0 %v53_v1  ;;  %v153_v12 = vld [vmem:[%s3596_s3] sm:$0xff]  ;;  %v2023_v16 = vld [vmem:[%s3596_s3 + $0x88] sm:$0xff]  ;;  %v2024_v19 = vld [vmem:[%s3596_s3 + $0x90] sm:$0xff] }
   0x6   :  { %2260 = vmatprep.subr.mxu0 %v52_v2  ;;  %2286 = vmatprep.mubr.msk.f32.mxu1 %vm55_vm0, %v153_v12  ;;  %v2022_v14 = vld [vmem:[%s3596_s3 + $0x80] sm:$0xff]  ;;  %v2025_v25 = vld [vmem:[%s3596_s3 + $0x98] sm:$0xff]  ;;  %v2028_v30 = vld [vmem:[%s3596_s3 + $0xb0] sm:$0xff] }
   0x7   :  { %2261 = vmatpush3.msra.mxu0 %v52_v2  ;;  %v2026_v23 = vld [vmem:[%s3596_s3 + $0xa0] sm:$0xff]  ;;  %v2027_v31 = vld [vmem:[%s3596_s3 + $0xa8] sm:$0xff]  ;;  %v2029_v37 = vld [vmem:[%s3596_s3 + $0xb8] sm:$0xff] }
   0x8   :  { %2262 = vmatprep.subr.mxu0 %v51_v4  ;;  %v2030_v36 = vld [vmem:[%s3596_s3 + $0xc0] sm:$0xff]  ;;  %v2032_v42 = vld [vmem:[%s3596_s3 + $0xd0] sm:$0xff]  ;;  %v2031_v43 = vld [vmem:[%s3596_s3 + $0xc8] sm:$0xff] }
   0x9   :  { %2263 = vmatpush3.msra.mxu0 %v51_v4  ;;  %v154_v44 = vld [vmem:[%s3596_s3 + $0x8] sm:$0xff]  ;;  %v155_v46 = vld [vmem:[%s3596_s3 + $0x10] sm:$0xff]  ;;  %v2034_v50 = vld [vmem:[%s3596_s3 + $0xe0] sm:$0xff] }
   0xa   :  { %2264 = vmatprep.subr.mxu0 %v50_v5  ;;  %v2033_v51 = vld [vmem:[%s3596_s3 + $0xd8] sm:$0xff]  ;;  %v157_v54 = vld [vmem:[%s3596_s3 + $0x20] sm:$0xff]  ;;  %v2036_v58 = vld [vmem:[%s3596_s3 + $0xf0] sm:$0xff] }
   0xb   :  { %2265 = vmatpush3.msra.mxu0 %v50_v5  ;;  %v156_v52 = vld [vmem:[%s3596_s3 + $0x18] sm:$0xff]  ;;  %v2035_v59 = vld [vmem:[%s3596_s3 + $0xe8] sm:$0xff]  ;;  %v159_v62 = vld [vmem:[%s3596_s3 + $0x30] sm:$0xff] }
   0xc   :  { %2266 = vmatprep.subr.mxu0 %v49_v6  ;;  %v158_v60 = vld [vmem:[%s3596_s3 + $0x28] sm:$0xff]  ;;  %v2037_v2 = vld [vmem:[%s3596_s3 + $0xf8] sm:$0xff]  ;;  %v161_v5 = vld [vmem:[%s3596_s3 + $0x40] sm:$0xff] }
   0xd   :  { %2267 = vmatpush3.msra.mxu0 %v49_v6  ;;  %v160_v3 = vld [vmem:[%s3596_s3 + $0x38] sm:$0xff]  ;;  %v165_v12 = vld [vmem:[%s3596_s3 + $0x60] sm:$0xff] }
   0xe   :  { %2268 = vmatprep.subr.mxu0 %v48_v7 }
   0xf   :  { %2269 = vmatpush3.msra.mxu0 %v48_v7 }
  0x10   :  { %2270 = vmatprep.subr.mxu0 %v47_v8 }
  0x11   :  { %2271 = vmatpush3.msra.mxu0 %v47_v8  ;;  %v162_v8 = vld [vmem:[%s3596_s3 + $0x48] sm:$0xff] }
  0x12   :  { %2273 = vmatmul.mubr.msk.f32.vlgmr.msra.gmra.mxu0 %vm55_vm0, %v43_v9  ;;  %v163_v9 = vld [vmem:[%s3596_s3 + $0x50] sm:$0xff] }
  0x13   :  { %2275 = vmatprep.mubr.msk.f32.mxu0 %vm55_vm0, %v44_v10 }
  0x16   :  { %2276 = vmatmul.mubr.msk.f32.gmra.mxu0 %vm55_vm0, %v45_v11  ;;  %v164_v11 = vld [vmem:[%s3596_s3 + $0x58] sm:$0xff] }
  0xd2   :  { %v2694_v13 = vpop.f32.mrf.mxu0 }
  0xd3   :  { %v392_v21 = vmul.f32 %v2694_v13, %v2023_v16  ;;  %v396_v35 = vmul.f32 %v2694_v13, %v2027_v31  ;;  %v400_v49 = vmul.f32 %v2694_v13, %v2031_v43  ;;  %v404_v1 = vmul.f32 %v2694_v13, %v2035_v59 }
  0xd4   :  { %v2699_v15 = vpop.f32.mrf.mxu0 }
  0xd5   :  { %v391_v17 = vmul.f32 %v2022_v14, %v2699_v15  ;;  %v410_v26 = vsel %vm55_vm0, %v392_v21, 0.0  ;;  %v395_v28 = vmul.f32 %v2026_v23, %v2699_v15  ;;  %v399_v39 = vmul.f32 %v2030_v36, %v2699_v15  ;;  %v167_v14 = vld [vmem:[%s3596_s3 + $0x70] sm:$0xff] }
  0xd6   :  { %v2705_v18 = vpop.f32.mrf.mxu0  ;;  %v422_v40 = vsel %vm55_vm0, %v396_v35, 0.0  ;;  %v403_v55 = vmul.f32 %v2034_v50, %v2699_v15  ;;  %v434_v56 = vsel %vm55_vm0, %v400_v49, 0.0  ;;  %v446_v6 = vsel %vm55_vm0, %v404_v1, 0.0 }
  0xd7   :  { %2278 = vmatprep.subr.msk.mxu1 %vm55_vm0, %v2705_v18  ;;  %2310 = vmatprep.subr.mxu0 %v2705_v18  ;;  %v407_v20 = vsel %vm55_vm0, %v391_v17, 0.0  ;;  %v394_v29 = vmul.f32 %v2705_v18, %v2025_v25  ;;  %v419_v32 = vsel %vm55_vm0, %v395_v28, 0.0  ;;  %v398_v41 = vmul.f32 %v2705_v18, %v2029_v37 }
  0xd8   :  { %408 = vadd.xlane.f32.xlu0 %v407_v20  ;;  %v2715_v22 = vpop.f32.mrf.mxu0  ;;  %2279 = vmatpush3.xpose.msk.msra.mxu1 %vm55_vm0, %v2705_v18  ;;  %v431_v45 = vsel %vm55_vm0, %v399_v39, 0.0  ;;  %v402_v57 = vmul.f32 %v2705_v18, %v2033_v51  ;;  %v443_v61 = vsel %vm55_vm0, %v403_v55, 0.0  ;;  %v406_v7 = vmul.f32 %v2705_v18, %v2037_v2  ;;  %v31_v55 = vld [vmem:[%s3597_s1 + $0x28] sm:$0xff] }
  0xd9   :  { %2311 = vmatpush3.msra.mxu0 %v2705_v18  ;;  %2280 = vmatprep.subr.msk.mxu1 %vm55_vm0, %v2715_v22  ;;  %v393_v24 = vmul.f32 %v2024_v19, %v2715_v22  ;;  %v397_v33 = vmul.f32 %v2028_v30, %v2715_v22  ;;  %v416_v34 = vsel %vm55_vm0, %v394_v29, 0.0  ;;  %v401_v47 = vmul.f32 %v2032_v42, %v2715_v22 }
  0xda   :  { %2312 = vmatprep.subr.mxu0 %v2715_v22  ;;  %v428_v48 = vsel %vm55_vm0, %v398_v41, 0.0  ;;  %v405_v63 = vmul.f32 %v2036_v58, %v2715_v22  ;;  %v440_v0 = vsel %vm55_vm0, %v402_v57, 0.0  ;;  %v452_v10 = vsel %vm55_vm0, %v406_v7, 0.0 }
  0xdb   :  { %2313 = vmatpush3.msra.mxu0 %v2715_v22  ;;  %v413_v27 = vsel %vm55_vm0, %v393_v24, 0.0  ;;  %v425_v38 = vsel %vm55_vm0, %v397_v33, 0.0  ;;  %v437_v53 = vsel %vm55_vm0, %v401_v47, 0.0  ;;  %v26_v33 = vld [vmem:[%s3597_s1] sm:$0xff]  ;;  %v28_v47 = vld [vmem:[%s3597_s1 + $0x10] sm:$0xff] }
  0xdc   :  { %2314 = vmatprep.subr.mxu0 %v2694_v13  ;;  %411 = vadd.xlane.f32.xlu0 %v410_v26  ;;  %v449_v4 = vsel %vm55_vm0, %v405_v63, 0.0  ;;  %v30_v63 = vld [vmem:[%s3597_s1 + $0x20] sm:$0xff] }
  0xdd   :  { %2315 = vmatpush3.msra.mxu0 %v2694_v13  ;;  %414 = vadd.xlane.f32.xlu1 %v413_v27  ;;  %v27_v27 = vld [vmem:[%s3597_s1 + $0x8] sm:$0xff] }
  0xde   :  { %2281 = vmatpush3.xpose.msk.msra.mxu1 %vm55_vm0, %v2715_v22  ;;  %2316 = vmatprep.subr.mxu0 %v2699_v15 }
  0xdf   :  { %2282 = vmatprep.subr.msk.mxu1 %vm55_vm0, %v2694_v13  ;;  %2317 = vmatpush3.msra.mxu0 %v2699_v15 }
  0xe0   :  { %420 = vadd.xlane.f32.xlu0 %v419_v32 }
  0xe1   :  { %417 = vadd.xlane.f32.xlu1 %v416_v34 }
  0xe2   :  { %2283 = vmatpush3.xpose.msk.msra.mxu1 %vm55_vm0, %v2694_v13  ;;  %v166_v13 = vld [vmem:[%s3596_s3 + $0x68] sm:$0xff] }
  0xe3   :  { %2284 = vmatprep.subr.msk.mxu1 %vm55_vm0, %v2699_v15 }
  0xe4   :  { %426 = vadd.xlane.f32.xlu0 %v425_v38 }
  0xe5   :  { %423 = vadd.xlane.f32.xlu1 %v422_v40  ;;  %v29_v40 = vld [vmem:[%s3597_s1 + $0x18] sm:$0xff] }
  0xe6   :  { %2285 = vmatpush3.xpose.msk.msra.mxu1 %vm55_vm0, %v2699_v15  ;;  %v168_v15 = vld [vmem:[%s3596_s3 + $0x78] sm:$0xff] }
  0xe8   :  { %432 = vadd.xlane.f32.xlu0 %v431_v45 }
  0xe9   :  { %2287 = vmatmul.mubr.msk.f32.vlgmr.msra.gmra.mxu1 %vm55_vm0, %v154_v44  ;;  %429 = vadd.xlane.f32.xlu1 %v428_v48 }
  0xea   :  { %2289 = vmatprep.mubr.msk.f32.mxu1 %vm55_vm0, %v155_v46 }
  0xec   :  { %438 = vadd.xlane.f32.xlu0 %v437_v53 }
  0xed   :  { %2290 = vmatmul.mubr.msk.f32.gmra.mxu1 %vm55_vm0, %v156_v52  ;;  %435 = vadd.xlane.f32.xlu1 %v434_v56 }
  0xee   :  { %2292 = vmatprep.mubr.msk.f32.mxu1 %vm55_vm0, %v157_v54 }
  0xf0   :  { %444 = vadd.xlane.f32.xlu0 %v443_v61 }
  0xf1   :  { %2293 = vmatmul.mubr.msk.f32.gmra.mxu1 %vm55_vm0, %v158_v60  ;;  %441 = vadd.xlane.f32.xlu1 %v440_v0 }
  0xf2   :  { %2295 = vmatprep.mubr.msk.f32.mxu1 %vm55_vm0, %v159_v62 }
  0xf4   :  { %450 = vadd.xlane.f32.xlu0 %v449_v4 }
  0xf5   :  { %2296 = vmatmul.mubr.msk.f32.gmra.mxu1 %vm55_vm0, %v160_v3  ;;  %447 = vadd.xlane.f32.xlu1 %v446_v6  ;;  %v33_v6 = vld [vmem:[%s3597_s1 + $0x38] sm:$0xff] }
  0xf6   :  { %2298 = vmatprep.mubr.msk.f32.mxu1 %vm55_vm0, %v161_v5 }
  0xf9   :  { %2299 = vmatmul.mubr.msk.f32.gmra.mxu1 %vm55_vm0, %v162_v8  ;;  %453 = vadd.xlane.f32.xlu1 %v452_v10 }
  0xfa   :  { %2301 = vmatprep.mubr.msk.f32.mxu1 %vm55_vm0, %v163_v9 }
  0xfd   :  { %2302 = vmatmul.mubr.msk.f32.gmra.mxu1 %vm55_vm0, %v164_v11 }
  0xfe   :  { %2304 = vmatprep.mubr.msk.f32.mxu1 %vm55_vm0, %v165_v12 }
 0x101   :  { %2305 = vmatmul.mubr.msk.f32.gmra.mxu1 %vm55_vm0, %v166_v13 }
 0x102   :  { %2307 = vmatprep.mubr.msk.f32.mxu1 %vm55_vm0, %v167_v14  ;;  %v32_v14 = vld [vmem:[%s3597_s1 + $0x30] sm:$0xff] }
 0x105   :  { %2308 = vmatmul.mubr.msk.f32.gmra.mxu1 %vm55_vm0, %v168_v15 }
 0x161   :  { %v409_v17 = vpop.xlane.xlu0 %408 }
 0x165   :  { %v412_v19 = vpop.xlane.xlu0 %411 }
 0x166   :  { %v415_v16 = vpop.xlane.xlu1 %414 }
 0x169   :  { %v421_v21 = vpop.xlane.xlu0 %420 }
 0x16a   :  { %v418_v18 = vpop.xlane.xlu1 %417 }
 0x16d   :  { %v427_v34 = vpop.xlane.xlu0 %426 }
 0x16e   :  { %v424_v20 = vpop.xlane.xlu1 %423 }
 0x171   :  { %v433_v56 = vpop.xlane.xlu0 %432 }
 0x172   :  { %v430_v28 = vpop.xlane.xlu1 %429 }
 0x175   :  { %v439_v15 = vpop.xlane.xlu0 %438 }
 0x176   :  { %v436_v48 = vpop.xlane.xlu1 %435 }
 0x17a   :  { %v442_v7 = vpop.xlane.xlu1 %441 }
 0x1a9   :  { %v2288_v22 = vpop.f32.mrf.mxu1 }
 0x1aa   :  { %v456_v23 = vadd.f32 %v2288_v22, %v412_v19  ;;  %v35_v22 = vld [vmem:[%s3597_s1 + $0x48] sm:$0xff] }
 0x1ab   :  { %v295_v24 = vpop.f32.mrf.mxu1 }
 0x1ac   :  { %vm472_vm1 = vcmp.gt.f32.partialorder %v456_v23, 0.0  ;;  %v488_v25 = vmul.f32 0.2, %v456_v23  ;;  %v455_v26 = vadd.f32 %v409_v17, %v295_v24 }
 0x1ad   :  { %v2291_v29 = vpop.f32.mrf.mxu1 }
 0x1ae   :  { %vm471_vm3 = vcmp.gt.f32.partialorder %v455_v26, 0.0  ;;  %v487_v30 = vmul.f32 0.2, %v455_v26  ;;  %v458_v31 = vadd.f32 %v2291_v29, %v418_v18  ;;  %v504_v32 = vsel %vm472_vm1, %v456_v23, %v488_v25  ;;  %v34_v29 = vld [vmem:[%s3597_s1 + $0x40] sm:$0xff] }
 0x1af   :  { %v305_v35 = vpop.f32.mrf.mxu1  ;;  %v2872_v36 = vadd.f32 %v504_v32, %v27_v27 }
 0x1b0   :  { %vm474_vm4 = vcmp.gt.f32.partialorder %v458_v31, 0.0  ;;  %v490_v37 = vmul.f32 0.2, %v458_v31  ;;  %v457_v38 = vadd.f32 %v415_v16, %v305_v35  ;;  %v503_v39 = vsel %vm471_vm3, %v455_v26, %v487_v30  ;;  %v448_v30 = vpop.xlane.xlu1 %447 }
 0x1b1   :  { %v2294_v41 = vpop.f32.mrf.mxu1  ;;  %v539_v42 = vsel %vm535_vm2, %v2872_v36, -inf  ;;  %v2879_v43 = vadd.f32 %v503_v39, %v26_v33  ;;  %v445_v39 = vpop.xlane.xlu0 %444 }
 0x1b2   :  { %vm473_vm5 = vcmp.gt.f32.partialorder %v457_v38, 0.0  ;;  %v489_v44 = vmul.f32 0.2, %v457_v38  ;;  %v460_v45 = vadd.f32 %v2294_v41, %v424_v20  ;;  %540 = vmax.xlane.f32.xlu1 %v539_v42  ;;  %v506_v46 = vsel %vm474_vm4, %v458_v31, %v490_v37 }
 0x1b3   :  { %v315_v49 = vpop.f32.mrf.mxu1  ;;  %v536_v50 = vsel %vm535_vm2, %v2879_v43, -inf  ;;  %v2886_v51 = vadd.f32 %v506_v46, %v29_v40 }
 0x1b4   :  { %vm476_vm6 = vcmp.gt.f32.partialorder %v460_v45, 0.0  ;;  %v492_v52 = vmul.f32 0.2, %v460_v45  ;;  %v459_v53 = vadd.f32 %v421_v21, %v315_v49  ;;  %537 = vmax.xlane.f32.xlu0 %v536_v50  ;;  %v505_v54 = vsel %vm473_vm5, %v457_v38, %v489_v44  ;;  %v37_v38 = vld [vmem:[%s3597_s1 + $0x58] sm:$0xff] }
 0x1b5   :  { %v2297_v57 = vpop.f32.mrf.mxu1  ;;  %v545_v58 = vsel %vm535_vm2, %v2886_v51, -inf  ;;  %v2893_v59 = vadd.f32 %v505_v54, %v28_v47  ;;  %v36_v47 = vld [vmem:[%s3597_s1 + $0x50] sm:$0xff] }
 0x1b6   :  { %vm475_vm7 = vcmp.gt.f32.partialorder %v459_v53, 0.0  ;;  %v491_v60 = vmul.f32 0.2, %v459_v53  ;;  %v462_v61 = vadd.f32 %v2297_v57, %v430_v28  ;;  %546 = vmax.xlane.f32.xlu1 %v545_v58  ;;  %v508_v62 = vsel %vm476_vm6, %v460_v45, %v492_v52 }
 0x1b7   :  { %v325_v0 = vpop.f32.mrf.mxu1  ;;  %v542_v1 = vsel %vm535_vm2, %v2893_v59, -inf  ;;  %v2900_v2 = vadd.f32 %v508_v62, %v31_v55  ;;  %v39_v55 = vld [vmem:[%s3597_s1 + $0x68] sm:$0xff] }
 0x1b8   :  { %vm478_vm8 = vcmp.gt.f32.partialorder %v462_v61, 0.0  ;;  %v494_v3 = vmul.f32 0.2, %v462_v61  ;;  %v461_v4 = vadd.f32 %v427_v34, %v325_v0  ;;  %543 = vmax.xlane.f32.xlu0 %v542_v1  ;;  %v507_v5 = vsel %vm475_vm7, %v459_v53, %v491_v60  ;;  %v38_v0 = vld [vmem:[%s3597_s1 + $0x60] sm:$0xff]  ;;  %v451_v1 = vpop.xlane.xlu0 %450 }
 0x1b9   :  { %v2300_v8 = vpop.f32.mrf.mxu1  ;;  %v551_v9 = vsel %vm535_vm2, %v2900_v2, -inf  ;;  %v2907_v10 = vadd.f32 %v507_v5, %v30_v63 }
 0x1ba   :  { %vm477_vm9 = vcmp.gt.f32.partialorder %v461_v4, 0.0  ;;  %v493_v11 = vmul.f32 0.2, %v461_v4  ;;  %v464_v12 = vadd.f32 %v2300_v8, %v436_v48  ;;  %552 = vmax.xlane.f32.xlu1 %v551_v9  ;;  %v510_v13 = vsel %vm478_vm8, %v462_v61, %v494_v3  ;;  %v41_v9 = vld [vmem:[%s3597_s1 + $0x78] sm:$0xff] }
 0x1bb   :  { %v335_v16 = vpop.f32.mrf.mxu1  ;;  %v548_v17 = vsel %vm535_vm2, %v2907_v10, -inf  ;;  %v2914_v18 = vadd.f32 %v510_v13, %v33_v6 }
 0x1bc   :  { %vm480_vm10 = vcmp.gt.f32.partialorder %v464_v12, 0.0  ;;  %v496_v19 = vmul.f32 0.2, %v464_v12  ;;  %v463_v20 = vadd.f32 %v433_v56, %v335_v16  ;;  %549 = vmax.xlane.f32.xlu0 %v548_v17  ;;  %v509_v21 = vsel %vm477_vm9, %v461_v4, %v493_v11  ;;  %v454_v56 = vpop.xlane.xlu1 %453 }
 0x1bd   :  { %v2303_v23 = vpop.f32.mrf.mxu1  ;;  %v557_v24 = vsel %vm535_vm2, %v2914_v18, -inf  ;;  %v2921_v25 = vadd.f32 %v509_v21, %v32_v14 }
 0x1be   :  { %vm479_vm11 = vcmp.gt.f32.partialorder %v463_v20, 0.0  ;;  %v495_v26 = vmul.f32 0.2, %v463_v20  ;;  %v466_v27 = vadd.f32 %v2303_v23, %v442_v7  ;;  %558 = vmax.xlane.f32.xlu1 %v557_v24  ;;  %v512_v28 = vsel %vm480_vm10, %v464_v12, %v496_v19 }
 0x1bf   :  { %v345_v31 = vpop.f32.mrf.mxu1  ;;  %v554_v32 = vsel %vm535_vm2, %v2921_v25, -inf  ;;  %v2928_v33 = vadd.f32 %v512_v28, %v35_v22 }
 0x1c0   :  { %vm482_vm12 = vcmp.gt.f32.partialorder %v466_v27, 0.0  ;;  %v498_v34 = vmul.f32 0.2, %v466_v27  ;;  %v465_v35 = vadd.f32 %v439_v15, %v345_v31  ;;  %555 = vmax.xlane.f32.xlu0 %v554_v32  ;;  %v511_v37 = vsel %vm479_vm11, %v463_v20, %v495_v26  ;;  %v40_v15 = vld [vmem:[%s3597_s1 + $0x70] sm:$0xff] }
 0x1c1   :  { %v2306_v40 = vpop.f32.mrf.mxu1  ;;  %v563_v41 = vsel %vm535_vm2, %v2928_v33, -inf  ;;  %v2935_v42 = vadd.f32 %v511_v37, %v34_v29 }
 0x1c2   :  { %vm481_vm13 = vcmp.gt.f32.partialorder %v465_v35, 0.0  ;;  %v497_v44 = vmul.f32 0.2, %v465_v35  ;;  %v468_v45 = vadd.f32 %v2306_v40, %v448_v30  ;;  %564 = vmax.xlane.f32.xlu1 %v563_v41  ;;  %v514_v46 = vsel %vm482_vm12, %v466_v27, %v498_v34 }
 0x1c3   :  { %v355_v48 = vpop.f32.mrf.mxu1  ;;  %v560_v49 = vsel %vm535_vm2, %v2935_v42, -inf  ;;  %v2942_v50 = vadd.f32 %v514_v46, %v37_v38 }
 0x1c4   :  { %vm484_vm14 = vcmp.gt.f32.partialorder %v468_v45, 0.0  ;;  %v500_v52 = vmul.f32 0.2, %v468_v45  ;;  %v467_v53 = vadd.f32 %v445_v39, %v355_v48  ;;  %561 = vmax.xlane.f32.xlu0 %v560_v49  ;;  %v513_v54 = vsel %vm481_vm13, %v465_v35, %v497_v44 }
 0x1c5   :  { %v2309_v57 = vpop.f32.mrf.mxu1  ;;  %v569_v58 = vsel %vm535_vm2, %v2942_v50, -inf  ;;  %v2949_v60 = vadd.f32 %v513_v54, %v36_v47 }
 0x1c6   :  { %vm483_vm15 = vcmp.gt.f32.partialorder %v467_v53, 0.0  ;;  %v499_v61 = vmul.f32 0.2, %v467_v53  ;;  %v470_v62 = vadd.f32 %v2309_v57, %v454_v56  ;;  %570 = vmax.xlane.f32.xlu1 %v569_v58  ;;  %v516_v63 = vsel %vm484_vm14, %v468_v45, %v500_v52 }
 0x1c7   :  { %v365_v3 = vpop.f32.mrf.mxu1  ;;  %v566_v4 = vsel %vm535_vm2, %v2949_v60, -inf  ;;  %v2956_v5 = vadd.f32 %v516_v63, %v39_v55 }
 0x1c8   :  { %vm486_vm1 = vcmp.gt.f32.partialorder %v470_v62, 0.0  ;;  %v502_v6 = vmul.f32 0.2, %v470_v62  ;;  %v469_v7 = vadd.f32 %v451_v1, %v365_v3  ;;  %567 = vmax.xlane.f32.xlu0 %v566_v4  ;;  %v515_v8 = vsel %vm483_vm15, %v467_v53, %v499_v61 }
 0x1c9   :  { %v575_v11 = vsel %vm535_vm2, %v2956_v5, -inf  ;;  %v2963_v12 = vadd.f32 %v515_v8, %v38_v0 }
 0x1ca   :  { %vm485_vm3 = vcmp.gt.f32.partialorder %v469_v7, 0.0  ;;  %v501_v13 = vmul.f32 0.2, %v469_v7  ;;  %576 = vmax.xlane.f32.xlu1 %v575_v11  ;;  %v518_v14 = vsel %vm486_vm1, %v470_v62, %v502_v6 }
 0x1cb   :  { %v572_v16 = vsel %vm535_vm2, %v2963_v12, -inf  ;;  %v2970_v17 = vadd.f32 %v518_v14, %v41_v9 }
 0x1cc   :  { %573 = vmax.xlane.f32.xlu0 %v572_v16  ;;  %v517_v19 = vsel %vm485_vm3, %v469_v7, %v501_v13 }
 0x1cd   :  { %v581_v20 = vsel %vm535_vm2, %v2970_v17, -inf  ;;  %v2974_v21 = vadd.f32 %v517_v19, %v40_v15 }
 0x1ce   :  { %582 = vmax.xlane.f32.xlu1 %v581_v20 }
 0x1cf   :  { %v578_v22 = vsel %vm535_vm2, %v2974_v21, -inf }
 0x1d0   :  { %579 = vmax.xlane.f32.xlu0 %v578_v22 }
 0x23b   :  { %v541_v23 = vpop.xlane.xlu1 %540 }
 0x23c   :  { %v585_v24 = vsub.f32 %v2872_v36, %v541_v23 }
 0x23d   :  { %v538_v26 = vpop.xlane.xlu0 %537 }
 0x23e   :  { %v602_v27 = vmul.f32 1.442695, %v585_v24  ;;  %v584_v28 = vsub.f32 %v2879_v43, %v538_v26 }
 0x23f   :  { %v547_v29 = vpop.xlane.xlu1 %546 }
 0x240   :  { %2466 = vpow2.f32 %v602_v27  ;;  %v600_v30 = vmul.f32 1.442695, %v584_v28  ;;  %v587_v31 = vsub.f32 %v2886_v51, %v547_v29 }
 0x241   :  { %v544_v32 = vpop.xlane.xlu0 %543 }
 0x242   :  { %2468 = vpow2.f32 %v600_v30  ;;  %v606_v34 = vmul.f32 1.442695, %v587_v31  ;;  %v586_v35 = vsub.f32 %v2893_v59, %v544_v32 }
 0x243   :  { %v553_v37 = vpop.xlane.xlu1 %552 }
 0x244   :  { %2470 = vpow2.f32 %v606_v34  ;;  %v604_v38 = vmul.f32 1.442695, %v586_v35  ;;  %v589_v39 = vsub.f32 %v2900_v2, %v553_v37 }
 0x245   :  { %v550_v36 = vpop.xlane.xlu0 %549 }
 0x246   :  { %2472 = vpow2.f32 %v604_v38  ;;  %v610_v40 = vmul.f32 1.442695, %v589_v39  ;;  %v588_v43 = vsub.f32 %v2907_v10, %v550_v36 }
 0x247   :  { %v559_v41 = vpop.xlane.xlu1 %558 }
 0x248   :  { %2474 = vpow2.f32 %v610_v40  ;;  %v608_v44 = vmul.f32 1.442695, %v588_v43  ;;  %v591_v51 = vsub.f32 %v2914_v18, %v559_v41 }
 0x249   :  { %v556_v45 = vpop.xlane.xlu0 %555 }
 0x24a   :  { %2476 = vpow2.f32 %v608_v44  ;;  %v614_v46 = vmul.f32 1.442695, %v591_v51  ;;  %v590_v59 = vsub.f32 %v2921_v25, %v556_v45 }
 0x24b   :  { %v565_v47 = vpop.xlane.xlu1 %564 }
 0x24c   :  { %2478 = vpow2.f32 %v614_v46  ;;  %v612_v48 = vmul.f32 1.442695, %v590_v59  ;;  %v593_v2 = vsub.f32 %v2928_v33, %v565_v47 }
 0x24d   :  { %v2987_v49 = vpop.eup %2466  ;;  %v562_v52 = vpop.xlane.xlu0 %561 }
 0x24e   :  { %2480 = vpow2.f32 %v612_v48  ;;  %v618_v10 = vmul.f32 1.442695, %v593_v2  ;;  %v592_v53 = vsub.f32 %v2935_v42, %v562_v52  ;;  %v635_v18 = vsel %vm535_vm2, %v2987_v49, 0.0 }
 0x24f   :  { %v2992_v54 = vpop.eup %2468  ;;  %v571_v55 = vpop.xlane.xlu1 %570  ;;  %636 = vadd.xlane.f32.xlu1 %v635_v18 }
 0x250   :  { %2482 = vpow2.f32 %v618_v10  ;;  %v616_v25 = vmul.f32 1.442695, %v592_v53  ;;  %v595_v56 = vsub.f32 %v2942_v50, %v571_v55  ;;  %v632_v33 = vsel %vm535_vm2, %v2992_v54, 0.0 }
 0x251   :  { %v2997_v57 = vpop.eup %2470  ;;  %v568_v58 = vpop.xlane.xlu0 %567  ;;  %633 = vadd.xlane.f32.xlu0 %v632_v33 }
 0x252   :  { %2484 = vpow2.f32 %v616_v25  ;;  %v622_v42 = vmul.f32 1.442695, %v595_v56  ;;  %v594_v61 = vsub.f32 %v2949_v60, %v568_v58  ;;  %v641_v62 = vsel %vm535_vm2, %v2997_v57, 0.0 }
 0x253   :  { %v3002_v63 = vpop.eup %2472  ;;  %v577_v0 = vpop.xlane.xlu1 %576  ;;  %642 = vadd.xlane.f32.xlu1 %v641_v62 }
 0x254   :  { %2486 = vpow2.f32 %v622_v42  ;;  %v620_v50 = vmul.f32 1.442695, %v594_v61  ;;  %v597_v1 = vsub.f32 %v2956_v5, %v577_v0  ;;  %v638_v3 = vsel %vm535_vm2, %v3002_v63, 0.0 }
 0x255   :  { %v3007_v4 = vpop.eup %2474  ;;  %v574_v6 = vpop.xlane.xlu0 %573  ;;  %639 = vadd.xlane.f32.xlu0 %v638_v3 }
 0x256   :  { %2488 = vpow2.f32 %v620_v50  ;;  %v626_v60 = vmul.f32 1.442695, %v597_v1  ;;  %v596_v7 = vsub.f32 %v2963_v12, %v574_v6  ;;  %v647_v8 = vsel %vm535_vm2, %v3007_v4, 0.0 }
 0x257   :  { %v3012_v9 = vpop.eup %2476  ;;  %648 = vadd.xlane.f32.xlu1 %v647_v8  ;;  %v583_v11 = vpop.xlane.xlu1 %582 }
 0x258   :  { %2490 = vpow2.f32 %v626_v60  ;;  %v624_v5 = vmul.f32 1.442695, %v596_v7  ;;  %v599_v13 = vsub.f32 %v2970_v17, %v583_v11  ;;  %v644_v14 = vsel %vm535_vm2, %v3012_v9, 0.0 }
 0x259   :  { %v3017_v15 = vpop.eup %2478  ;;  %645 = vadd.xlane.f32.xlu0 %v644_v14  ;;  %v580_v16 = vpop.xlane.xlu0 %579 }
 0x25a   :  { %2492 = vpow2.f32 %v624_v5  ;;  %v630_v12 = vmul.f32 1.442695, %v599_v13  ;;  %v598_v19 = vsub.f32 %v2974_v21, %v580_v16  ;;  %v653_v20 = vsel %vm535_vm2, %v3017_v15, 0.0 }
 0x25b   :  { %v3022_v22 = vpop.eup %2480  ;;  %654 = vadd.xlane.f32.xlu1 %v653_v20 }
 0x25c   :  { %2494 = vpow2.f32 %v630_v12  ;;  %v628_v23 = vmul.f32 1.442695, %v598_v19  ;;  %v650_v17 = vsel %vm535_vm2, %v3022_v22, 0.0 }
 0x25d   :  { %v3026_v24 = vpop.eup %2482  ;;  %651 = vadd.xlane.f32.xlu0 %v650_v17 }
 0x25e   :  { %2496 = vpow2.f32 %v628_v23  ;;  %v659_v26 = vsel %vm535_vm2, %v3026_v24, 0.0 }
 0x25f   :  { %v3030_v27 = vpop.eup %2484  ;;  %660 = vadd.xlane.f32.xlu1 %v659_v26  ;;  %v2061_v26 = vld [vmem:[%s3594_s2 + $0x70] sm:$0xff] }
 0x260   :  { %v656_v21 = vsel %vm535_vm2, %v3030_v27, 0.0 }
 0x261   :  { %v3034_v28 = vpop.eup %2486  ;;  %657 = vadd.xlane.f32.xlu0 %v656_v21  ;;  %v2059_v21 = vld [vmem:[%s3594_s2 + $0x60] sm:$0xff] }
 0x262   :  { %v665_v29 = vsel %vm535_vm2, %v3034_v28, 0.0 }
 0x263   :  { %v3038_v30 = vpop.eup %2488  ;;  %666 = vadd.xlane.f32.xlu1 %v665_v29  ;;  %v2057_v29 = vld [vmem:[%s3594_s2 + $0x50] sm:$0xff] }
 0x264   :  { %v662_v31 = vsel %vm535_vm2, %v3038_v30, 0.0 }
 0x265   :  { %v3042_v32 = vpop.eup %2490  ;;  %663 = vadd.xlane.f32.xlu0 %v662_v31  ;;  %v2055_v31 = vld [vmem:[%s3594_s2 + $0x40] sm:$0xff] }
 0x266   :  { %v671_v34 = vsel %vm535_vm2, %v3042_v32, 0.0 }
 0x267   :  { %v3046_v35 = vpop.eup %2492  ;;  %672 = vadd.xlane.f32.xlu1 %v671_v34  ;;  %v905_v34 = vlaneseq }
 0x268   :  { %v668_v37 = vsel %vm535_vm2, %v3046_v35, 0.0 }
 0x269   :  { %v3050_v38 = vpop.eup %2494  ;;  %669 = vadd.xlane.f32.xlu0 %v668_v37 }
 0x26a   :  { %v677_v39 = vsel %vm535_vm2, %v3050_v38, 0.0 }
 0x26b   :  { %v3054_v36 = vpop.eup %2496  ;;  %678 = vadd.xlane.f32.xlu1 %v677_v39 }
 0x26c   :  { %v674_v40 = vsel %vm535_vm2, %v3054_v36, 0.0 }
 0x26d   :  { %675 = vadd.xlane.f32.xlu0 %v674_v40 }
 0x2d8   :  { %v637_v43 = vpop.xlane.xlu1 %636 }
 0x2d9   :  { %2498 = vrcp.f32 %v637_v43 }
 0x2da   :  { %v634_v41 = vpop.xlane.xlu0 %633 }
 0x2db   :  { %2500 = vrcp.f32 %v634_v41  ;;  %v46_v41 = vld [vmem:[%s3598_s4] sm:$0x1f] }
 0x2dc   :  { %v643_v44 = vpop.xlane.xlu1 %642 }
 0x2dd   :  { %2502 = vrcp.f32 %v643_v44 }
 0x2de   :  { %v640_v51 = vpop.xlane.xlu0 %639 }
 0x2df   :  { %2504 = vrcp.f32 %v640_v51 }
 0x2e0   :  { %v649_v45 = vpop.xlane.xlu1 %648 }
 0x2e1   :  { %2506 = vrcp.f32 %v649_v45 }
 0x2e2   :  { %v646_v46 = vpop.xlane.xlu0 %645 }
 0x2e3   :  { %2508 = vrcp.f32 %v646_v46 }
 0x2e4   :  { %v655_v59 = vpop.xlane.xlu1 %654 }
 0x2e5   :  { %2510 = vrcp.f32 %v655_v59 }
 0x2e6   :  { %v652_v47 = vpop.xlane.xlu0 %651  ;;  %v2499_v48 = vpop.eup %2498 }
 0x2e7   :  { %2512 = vrcp.f32 %v652_v47  ;;  %v697_v53 = vmul.f32 %v2499_v48, %v2987_v49 }
 0x2e8   :  { %v2501_v2 = vpop.eup %2500  ;;  %v661_v52 = vpop.xlane.xlu1 %660 }
 0x2e9   :  { %v696_v10 = vmul.f32 %v2501_v2, %v2992_v54  ;;  %2514 = vrcp.f32 %v661_v52 }
 0x2ea   :  { %v658_v18 = vpop.xlane.xlu0 %657  ;;  %v2503_v55 = vpop.eup %2502 }
 0x2eb   :  { %2516 = vrcp.f32 %v658_v18  ;;  %2318 = vmatprep.mubr.msk.f32.mxu0 %vm535_vm2, %v696_v10  ;;  %v699_v42 = vmul.f32 %v2503_v55, %v2997_v57 }
 0x2ec   :  { %v2505_v25 = vpop.eup %2504  ;;  %v667_v56 = vpop.xlane.xlu1 %666  ;;  %2319 = vmatmul.mubr.msk.f32.vlgmr.msra.gmra.mxu0 %vm535_vm2, %v697_v53 }
 0x2ed   :  { %v698_v33 = vmul.f32 %v2505_v25, %v3002_v63  ;;  %2518 = vrcp.f32 %v667_v56 }
 0x2ee   :  { %v664_v58 = vpop.xlane.xlu0 %663  ;;  %v2507_v61 = vpop.eup %2506 }
 0x2ef   :  { %2520 = vrcp.f32 %v664_v58  ;;  %2321 = vmatprep.mubr.msk.f32.mxu0 %vm535_vm2, %v698_v33  ;;  %v701_v50 = vmul.f32 %v2507_v61, %v3007_v4 }
 0x2f0   :  { %v2509_v49 = vpop.eup %2508  ;;  %v673_v54 = vpop.xlane.xlu1 %672  ;;  %2322 = vmatmul.mubr.msk.f32.gmra.mxu0 %vm535_vm2, %v699_v42 }
 0x2f1   :  { %v700_v62 = vmul.f32 %v2509_v49, %v3012_v9  ;;  %2522 = vrcp.f32 %v673_v54 }
 0x2f2   :  { %v670_v0 = vpop.xlane.xlu0 %669  ;;  %v2511_v1 = vpop.eup %2510 }
 0x2f3   :  { %2524 = vrcp.f32 %v670_v0  ;;  %2324 = vmatprep.mubr.msk.f32.mxu0 %vm535_vm2, %v700_v62  ;;  %v703_v60 = vmul.f32 %v2511_v1, %v3017_v15 }
 0x2f4   :  { %v2513_v63 = vpop.eup %2512  ;;  %v679_v57 = vpop.xlane.xlu1 %678  ;;  %2325 = vmatmul.mubr.msk.f32.gmra.mxu0 %vm535_vm2, %v701_v50 }
 0x2f5   :  { %v702_v3 = vmul.f32 %v2513_v63, %v3022_v22  ;;  %2526 = vrcp.f32 %v679_v57 }
 0x2f6   :  { %v676_v6 = vpop.xlane.xlu0 %675  ;;  %v2515_v7 = vpop.eup %2514 }
 0x2f7   :  { %2528 = vrcp.f32 %v676_v6  ;;  %2327 = vmatprep.mubr.msk.f32.mxu0 %vm535_vm2, %v702_v3  ;;  %v705_v9 = vmul.f32 %v2515_v7, %v3026_v24  ;;  %v2062_v24 = vld [vmem:[%s3594_s2 + $0x78] sm:$0xff] }
 0x2f8   :  { %v2517_v8 = vpop.eup %2516  ;;  %2328 = vmatmul.mubr.msk.f32.gmra.mxu0 %vm535_vm2, %v703_v60  ;;  %2342 = vmatprep.subr.mxu1 %v2062_v24 }
 0x2f9   :  { %v704_v4 = vmul.f32 %v2517_v8, %v3030_v27  ;;  %2343 = vmatpush3.msra.mxu1 %v2062_v24  ;;  %v2060_v27 = vld [vmem:[%s3594_s2 + $0x68] sm:$0xff] }
 0x2fa   :  { %v2519_v11 = vpop.eup %2518  ;;  %2344 = vmatprep.subr.mxu1 %v2061_v26 }
 0x2fb   :  { %2330 = vmatprep.mubr.msk.f32.mxu0 %vm535_vm2, %v704_v4  ;;  %v707_v14 = vmul.f32 %v2519_v11, %v3034_v28  ;;  %2345 = vmatpush3.msra.mxu1 %v2061_v26  ;;  %v2058_v28 = vld [vmem:[%s3594_s2 + $0x58] sm:$0xff] }
 0x2fc   :  { %v2521_v5 = vpop.eup %2520  ;;  %2331 = vmatmul.mubr.msk.f32.gmra.mxu0 %vm535_vm2, %v705_v9  ;;  %2346 = vmatprep.subr.mxu1 %v2060_v27 }
 0x2fd   :  { %v706_v13 = vmul.f32 %v2521_v5, %v3038_v30  ;;  %2347 = vmatpush3.msra.mxu1 %v2060_v27  ;;  %v2056_v30 = vld [vmem:[%s3594_s2 + $0x48] sm:$0xff] }
 0x2fe   :  { %v2523_v15 = vpop.eup %2522  ;;  %2348 = vmatprep.subr.mxu1 %v2059_v21 }
 0x2ff   :  { %2333 = vmatprep.mubr.msk.f32.mxu0 %vm535_vm2, %v706_v13  ;;  %v709_v19 = vmul.f32 %v2523_v15, %v3042_v32  ;;  %2349 = vmatpush3.msra.mxu1 %v2059_v21 }
 0x300   :  { %v2525_v16 = vpop.eup %2524  ;;  %2334 = vmatmul.mubr.msk.f32.gmra.mxu0 %vm535_vm2, %v707_v14  ;;  %2350 = vmatprep.subr.mxu1 %v2058_v28 }
 0x301   :  { %v708_v12 = vmul.f32 %v2525_v16, %v3046_v35  ;;  %2351 = vmatpush3.msra.mxu1 %v2058_v28 }
 0x302   :  { %v2527_v20 = vpop.eup %2526  ;;  %2352 = vmatprep.subr.mxu1 %v2057_v29 }
 0x303   :  { %2336 = vmatprep.mubr.msk.f32.mxu0 %vm535_vm2, %v708_v12  ;;  %v711_v17 = vmul.f32 %v2527_v20, %v3050_v38  ;;  %2353 = vmatpush3.msra.mxu1 %v2057_v29  ;;  %v3114_v38 = vshrl.u32 %v905_v34, 7  ;;  %v2067_v34 = vld [vmem:[%s3596_s3 + $0x100] sm:$0xff] }
 0x304   :  { %v2529_v22 = vpop.eup %2528  ;;  %2337 = vmatmul.mubr.msk.f32.gmra.mxu0 %vm535_vm2, %v709_v19  ;;  %2354 = vmatprep.subr.mxu1 %v2056_v30 }
 0x305   :  { %v710_v23 = vmul.f32 %v2529_v22, %v3054_v36  ;;  %2355 = vmatpush3.msra.mxu1 %v2056_v30  ;;  %v907_v40 = vsub.s32 0, %v3114_v38  ;;  %v923_v44 = vsub.s32 1, %v3114_v38  ;;  %v915_v46 = vsub.s32 4, %v3114_v38 }
 0x306   :  { %2356 = vmatprep.subr.mxu1 %v2055_v31  ;;  %v935_v47 = vsub.s32 2, %v3114_v38  ;;  %v947_v52 = vsub.s32 3, %v3114_v38 }
 0x307   :  { %2339 = vmatprep.mubr.msk.f32.mxu0 %vm535_vm2, %v710_v23  ;;  %2357 = vmatpush3.msra.mxu1 %v2055_v31  ;;  %v908_v45 = vrot.slane %v46_v41, %v907_v40  ;;  %v924_v48 = vrot.slane %v46_v41, %v923_v44  ;;  %v916_v53 = vrot.slane %v46_v41, %v915_v46 }
 0x308   :  { %2340 = vmatmul.mubr.msk.f32.gmra.mxu0 %vm535_vm2, %v711_v17  ;;  %v936_v18 = vrot.slane %v46_v41, %v935_v47  ;;  %v948_v42 = vrot.slane %v46_v41, %v947_v52  ;;  %v2106_v41 = vld [vmem:[%s3596_s3 + $0x198] sm:$0xff] }
 0x309   :  { %2372 = vmatprep.mubr.msk.f32.mxu0 %vm55_vm0, %v2067_v34 }
 0x3ac   :  { %v2320_v32 = vpop.f32.mrf.mxu0 }
 0x3ad   :  { %v910_v10 = vmul.f32 %v2320_v32, %v908_v45 }
 0x3ae   :  { %v826_v35 = vpop.f32.mrf.mxu0 }
 0x3af   :  { %v909_v25 = vmul.f32 %v908_v45, %v826_v35  ;;  %v918_v61 = vadd.f32 %v916_v53, %v910_v10  ;;  %v2104_v35 = vld [vmem:[%s3596_s3 + $0x188] sm:$0xff] }
 0x3b0   :  { %v2323_v37 = vpop.f32.mrf.mxu0 }
 0x3b1   :  { %v912_v49 = vmul.f32 %v2323_v37, %v908_v45  ;;  %v917_v0 = vadd.f32 %v916_v53, %v909_v25 }
 0x3b2   :  { %v836_v39 = vpop.f32.mrf.mxu0 }
 0x3b3   :  { %v911_v50 = vmul.f32 %v908_v45, %v836_v39  ;;  %v920_v8 = vadd.f32 %v916_v53, %v912_v49  ;;  %v2103_v39 = vld [vmem:[%s3596_s3 + $0x180] sm:$0xff]  ;;  %v2109_v49 = vld [vmem:[%s3596_s3 + $0x1b0] sm:$0xff] }
 0x3b4   :  { %v2326_v36 = vpop.f32.mrf.mxu0 }
 0x3b5   :  { %v926_v56 = vmul.f32 %v2326_v36, %v924_v48  ;;  %v919_v5 = vadd.f32 %v916_v53, %v911_v50  ;;  %v2108_v53 = vld [vmem:[%s3596_s3 + $0x1a8] sm:$0xff] }
 0x3b6   :  { %v846_v43 = vpop.f32.mrf.mxu0 }
 0x3b7   :  { %v925_v58 = vmul.f32 %v924_v48, %v846_v43  ;;  %v930_v63 = vadd.f32 %v926_v56, %v918_v61  ;;  %v2110_v61 = vld [vmem:[%s3596_s3 + $0x1b8] sm:$0xff] }
 0x3b8   :  { %v2329_v51 = vpop.f32.mrf.mxu0 }
 0x3b9   :  { %v928_v57 = vmul.f32 %v2329_v51, %v924_v48  ;;  %v929_v6 = vadd.f32 %v925_v58, %v917_v0 }
 0x3ba   :  { %v856_v59 = vpop.f32.mrf.mxu0 }
 0x3bb   :  { %v927_v60 = vmul.f32 %v924_v48, %v856_v59  ;;  %v932_v16 = vadd.f32 %v928_v57, %v920_v8  ;;  %v2105_v48 = vld [vmem:[%s3596_s3 + $0x190] sm:$0xff] }
 0x3bc   :  { %v2332_v2 = vpop.f32.mrf.mxu0  ;;  %v2113_v8 = vld [vmem:[%s3596_s3 + $0x1d0] sm:$0xff] }
 0x3bd   :  { %v938_v54 = vmul.f32 %v2332_v2, %v936_v18  ;;  %v931_v20 = vadd.f32 %v927_v60, %v919_v5  ;;  %v2069_v5 = vld [vmem:[%s3596_s3 + $0x110] sm:$0xff] }
 0x3be   :  { %v866_v55 = vpop.f32.mrf.mxu0 }
 0x3bf   :  { %v937_v1 = vmul.f32 %v936_v18, %v866_v55  ;;  %v942_v4 = vadd.f32 %v938_v54, %v930_v63  ;;  %v2107_v55 = vld [vmem:[%s3596_s3 + $0x1a0] sm:$0xff] }
 0x3c0   :  { %v2335_v33 = vpop.f32.mrf.mxu0  ;;  %v2111_v63 = vld [vmem:[%s3596_s3 + $0x1c0] sm:$0xff] }
 0x3c1   :  { %v940_v9 = vmul.f32 %v2335_v33, %v936_v18  ;;  %v941_v13 = vadd.f32 %v937_v1, %v929_v6  ;;  %v2112_v1 = vld [vmem:[%s3596_s3 + $0x1c8] sm:$0xff] }
 0x3c2   :  { %v876_v62 = vpop.f32.mrf.mxu0 }
 0x3c3   :  { %v939_v14 = vmul.f32 %v936_v18, %v876_v62  ;;  %v944_v17 = vadd.f32 %v940_v9, %v932_v16  ;;  %v2115_v16 = vld [vmem:[%s3596_s3 + $0x1e0] sm:$0xff] }
 0x3c4   :  { %v2338_v3 = vpop.f32.mrf.mxu0 }
 0x3c5   :  { %v950_v7 = vmul.f32 %v2338_v3, %v948_v42  ;;  %v943_v26 = vadd.f32 %v939_v14, %v931_v20 }
 0x3c6   :  { %v886_v11 = vpop.f32.mrf.mxu0 }
 0x3c7   :  { %v949_v15 = vmul.f32 %v948_v42, %v886_v11  ;;  %v954_v12 = vadd.f32 %v950_v7, %v942_v4  ;;  %v2114_v7 = vld [vmem:[%s3596_s3 + $0x1d8] sm:$0xff]  ;;  %v2068_v4 = vld [vmem:[%s3596_s3 + $0x108] sm:$0xff] }
 0x3c8   :  { %v2341_v19 = vpop.f32.mrf.mxu0 }
 0x3c9   :  { %v953_v22 = vadd.f32 %v949_v15, %v941_v13  ;;  %v952_v23 = vmul.f32 %v2341_v19, %v948_v42  ;;  %v958_v28 = vmax.f32 %v954_v12, 0.0  ;;  %v2116_v15 = vld [vmem:[%s3596_s3 + $0x1e8] sm:$0xff]  ;;  %v2070_v12 = vld [vmem:[%s3596_s3 + $0x118] sm:$0xff] }
 0x3ca   :  { %v896_v24 = vpop.f32.mrf.mxu0 }
 0x3cb   :  { %v957_v27 = vmax.f32 %v953_v22, 0.0  ;;  %v951_v21 = vmul.f32 %v948_v42, %v896_v24  ;;  %v956_v29 = vadd.f32 %v952_v23, %v944_v17  ;;  %v2071_v22 = vld [vmem:[%s3596_s3 + $0x120] sm:$0xff]  ;;  %v2118_v24 = vld [vmem:[%s3596_s3 + $0x1f8] sm:$0xff] }
 0x3cd   :  { %v955_v30 = vadd.f32 %v951_v21, %v943_v26  ;;  %2358 = vmatprep.mubr.msk.f32.mxu1 %vm55_vm0, %v957_v27  ;;  %v960_v32 = vmax.f32 %v956_v29, 0.0  ;;  %v2117_v26 = vld [vmem:[%s3596_s3 + $0x1f0] sm:$0xff]  ;;  %v2072_v27 = vld [vmem:[%s3596_s3 + $0x128] sm:$0xff] }
 0x3ce   :  { %2359 = vmatmul.mubr.msk.f32.vlgmr.msra.gmra.mxu1 %vm55_vm0, %v958_v28  ;;  %v2073_v29 = vld [vmem:[%s3596_s3 + $0x130] sm:$0xff] }
 0x3cf   :  { %v959_v31 = vmax.f32 %v955_v30, 0.0 }
 0x3d1   :  { %2361 = vmatprep.mubr.msk.f32.mxu1 %vm55_vm0, %v959_v31 }
 0x3d2   :  { %2362 = vmatmul.mubr.msk.f32.gmra.mxu1 %vm55_vm0, %v960_v32  ;;  %v2074_v32 = vld [vmem:[%s3596_s3 + $0x138] sm:$0xff] }
 0x48e   :  { %v3145_v37 = vpop.f32.mrf.mxu1 }
 0x48f   :  { %v1309_v36 = vmul.f32 %v3145_v37, %v2104_v35  ;;  %v1313_v33 = vmul.f32 %v3145_v37, %v2108_v53  ;;  %v1317_v3 = vmul.f32 %v3145_v37, %v2112_v1  ;;  %v1321_v20 = vmul.f32 %v3145_v37, %v2116_v15  ;;  %v2075_v35 = vld [vmem:[%s3596_s3 + $0x140] sm:$0xff] }
 0x490   :  { %v3151_v43 = vpop.f32.mrf.mxu1 }
 0x491   :  { %v1327_v51 = vsel %vm55_vm0, %v1309_v36, 0.0  ;;  %v1308_v45 = vmul.f32 %v2103_v39, %v3151_v43  ;;  %v1312_v42 = vmul.f32 %v2107_v55, %v3151_v43  ;;  %v1339_v54 = vsel %vm55_vm0, %v1313_v33, 0.0  ;;  %v2076_v39 = vld [vmem:[%s3596_s3 + $0x148] sm:$0xff]  ;;  %v2077_v36 = vld [vmem:[%s3596_s3 + $0x150] sm:$0xff] }
 0x492   :  { %1328 = vadd.xlane.f32.xlu1 %v1327_v51  ;;  %v3158_v59 = vpop.f32.mrf.mxu1  ;;  %v1316_v60 = vmul.f32 %v2111_v63, %v3151_v43  ;;  %v1351_v9 = vsel %vm55_vm0, %v1317_v3, 0.0  ;;  %v1320_v17 = vmul.f32 %v2115_v16, %v3151_v43  ;;  %v1363_v21 = vsel %vm55_vm0, %v1321_v20, 0.0  ;;  %v2080_v51 = vld [vmem:[%s3596_s3 + $0x168] sm:$0xff] }
 0x493   :  { %2364 = vmatprep.subr.msk.mxu0 %vm55_vm0, %v3158_v59  ;;  %2396 = vmatprep.subr.mxu1 %v3158_v59  ;;  %v1324_v2 = vsel %vm55_vm0, %v1308_v45, 0.0  ;;  %v1311_v10 = vmul.f32 %v3158_v59, %v2106_v41  ;;  %v1315_v62 = vmul.f32 %v3158_v59, %v2110_v61  ;;  %v1336_v0 = vsel %vm55_vm0, %v1312_v42, 0.0  ;;  %v2079_v41 = vld [vmem:[%s3596_s3 + $0x160] sm:$0xff]  ;;  %v2081_v45 = vld [vmem:[%s3596_s3 + $0x170] sm:$0xff]  ;;  %v2594_v63 = vld [vmem:[%s3597_s1 + $0x8] sm:$0xff] }
 0x494   :  { %1325 = vadd.xlane.f32.xlu0 %v1324_v2  ;;  %v3171_v18 = vpop.f32.mrf.mxu1  ;;  %2365 = vmatpush3.xpose.msk.msra.mxu0 %vm55_vm0, %v3158_v59  ;;  %v1319_v11 = vmul.f32 %v3158_v59, %v2114_v7  ;;  %v1348_v13 = vsel %vm55_vm0, %v1316_v60, 0.0  ;;  %v1323_v28 = vmul.f32 %v3158_v59, %v2118_v24  ;;  %v1360_v30 = vsel %vm55_vm0, %v1320_v17, 0.0 }
 0x495   :  { %2397 = vmatpush3.msra.mxu1 %v3158_v59  ;;  %2366 = vmatprep.subr.msk.mxu0 %vm55_vm0, %v3171_v18  ;;  %v1333_v25 = vsel %vm55_vm0, %v1311_v10, 0.0  ;;  %v1310_v56 = vmul.f32 %v2105_v48, %v3171_v18  ;;  %v1314_v50 = vmul.f32 %v2109_v49, %v3171_v18  ;;  %v1345_v57 = vsel %vm55_vm0, %v1315_v62, 0.0  ;;  %v2082_v59 = vld [vmem:[%s3596_s3 + $0x178] sm:$0xff] }
 0x496   :  { %2398 = vmatprep.subr.mxu1 %v3171_v18  ;;  %1334 = vadd.xlane.f32.xlu1 %v1333_v25  ;;  %v1318_v14 = vmul.f32 %v2113_v8, %v3171_v18  ;;  %v1357_v19 = vsel %vm55_vm0, %v1319_v11, 0.0  ;;  %v1322_v31 = vmul.f32 %v2117_v26, %v3171_v18  ;;  %v1369_v34 = vsel %vm55_vm0, %v1323_v28, 0.0 }
 0x497   :  { %2399 = vmatpush3.msra.mxu1 %v3171_v18  ;;  %v1330_v58 = vsel %vm55_vm0, %v1310_v56, 0.0  ;;  %v1342_v6 = vsel %vm55_vm0, %v1314_v50, 0.0 }
 0x498   :  { %2400 = vmatprep.subr.mxu1 %v3145_v37  ;;  %1331 = vadd.xlane.f32.xlu0 %v1330_v58  ;;  %v1354_v23 = vsel %vm55_vm0, %v1318_v14, 0.0 }
 0x499   :  { %2401 = vmatpush3.msra.mxu1 %v3145_v37  ;;  %2367 = vmatpush3.xpose.msk.msra.mxu0 %vm55_vm0, %v3171_v18 }
 0x49a   :  { %2368 = vmatprep.subr.msk.mxu0 %vm55_vm0, %v3145_v37  ;;  %2402 = vmatprep.subr.mxu1 %v3151_v43 }
 0x49b   :  { %1340 = vadd.xlane.f32.xlu1 %v1339_v54  ;;  %2403 = vmatpush3.msra.mxu1 %v3151_v43 }
 0x49c   :  { %1337 = vadd.xlane.f32.xlu0 %v1336_v0 }
 0x49d   :  { %2369 = vmatpush3.xpose.msk.msra.mxu0 %vm55_vm0, %v3145_v37  ;;  %v1366_v37 = vsel %vm55_vm0, %v1322_v31, 0.0 }
 0x49e   :  { %2370 = vmatprep.subr.msk.mxu0 %vm55_vm0, %v3151_v43 }
 0x49f   :  { %1346 = vadd.xlane.f32.xlu1 %v1345_v57 }
 0x4a0   :  { %1343 = vadd.xlane.f32.xlu0 %v1342_v6 }
 0x4a1   :  { %2371 = vmatpush3.xpose.msk.msra.mxu0 %vm55_vm0, %v3151_v43  ;;  %v2078_v43 = vld [vmem:[%s3596_s3 + $0x158] sm:$0xff] }
 0x4a3   :  { %1352 = vadd.xlane.f32.xlu1 %v1351_v9 }
 0x4a4   :  { %2373 = vmatmul.mubr.msk.f32.vlgmr.msra.gmra.mxu0 %vm55_vm0, %v2068_v4  ;;  %1349 = vadd.xlane.f32.xlu0 %v1348_v13  ;;  %v2595_v4 = vld [vmem:[%s3597_s1] sm:$0xff] }
 0x4a5   :  { %2375 = vmatprep.mubr.msk.f32.mxu0 %vm55_vm0, %v2069_v5 }
 0x4a7   :  { %1358 = vadd.xlane.f32.xlu1 %v1357_v19 }
 0x4a8   :  { %2376 = vmatmul.mubr.msk.f32.gmra.mxu0 %vm55_vm0, %v2070_v12  ;;  %1355 = vadd.xlane.f32.xlu0 %v1354_v23  ;;  %v2596_v12 = vld [vmem:[%s3597_s1 + $0x18] sm:$0xff] }
 0x4a9   :  { %2378 = vmatprep.mubr.msk.f32.mxu0 %vm55_vm0, %v2071_v22 }
 0x4ab   :  { %1364 = vadd.xlane.f32.xlu1 %v1363_v21 }
 0x4ac   :  { %2379 = vmatmul.mubr.msk.f32.gmra.mxu0 %vm55_vm0, %v2072_v27  ;;  %1361 = vadd.xlane.f32.xlu0 %v1360_v30  ;;  %v2597_v27 = vld [vmem:[%s3597_s1 + $0x10] sm:$0xff] }
 0x4ad   :  { %2381 = vmatprep.mubr.msk.f32.mxu0 %vm55_vm0, %v2073_v29 }
 0x4af   :  { %1370 = vadd.xlane.f32.xlu1 %v1369_v34  ;;  %v2598_v34 = vld [vmem:[%s3597_s1 + $0x28] sm:$0xff] }
 0x4b0   :  { %2382 = vmatmul.mubr.msk.f32.gmra.mxu0 %vm55_vm0, %v2074_v32  ;;  %1367 = vadd.xlane.f32.xlu0 %v1366_v37 }
 0x4b1   :  { %2384 = vmatprep.mubr.msk.f32.mxu0 %vm55_vm0, %v2075_v35 }
 0x4b4   :  { %2385 = vmatmul.mubr.msk.f32.gmra.mxu0 %vm55_vm0, %v2076_v39 }
 0x4b5   :  { %2387 = vmatprep.mubr.msk.f32.mxu0 %vm55_vm0, %v2077_v36 }
 0x4b8   :  { %2388 = vmatmul.mubr.msk.f32.gmra.mxu0 %vm55_vm0, %v2078_v43 }
 0x4b9   :  { %2390 = vmatprep.mubr.msk.f32.mxu0 %vm55_vm0, %v2079_v41 }
 0x4bc   :  { %2391 = vmatmul.mubr.msk.f32.gmra.mxu0 %vm55_vm0, %v2080_v51 }
 0x4bd   :  { %2393 = vmatprep.mubr.msk.f32.mxu0 %vm55_vm0, %v2081_v45  ;;  %v2599_v45 = vld [vmem:[%s3597_s1 + $0x20] sm:$0xff] }
 0x4c0   :  { %2394 = vmatmul.mubr.msk.f32.gmra.mxu0 %vm55_vm0, %v2082_v59 }
 0x51b   :  { %v1329_v48 = vpop.xlane.xlu1 %1328 }
 0x51d   :  { %v1326_v2 = vpop.xlane.xlu0 %1325 }
 0x51f   :  { %v1335_v10 = vpop.xlane.xlu1 %1334 }
 0x521   :  { %v1332_v53 = vpop.xlane.xlu0 %1331 }
 0x524   :  { %v1341_v18 = vpop.xlane.xlu1 %1340 }
 0x525   :  { %v1338_v55 = vpop.xlane.xlu0 %1337 }
 0x528   :  { %v1347_v61 = vpop.xlane.xlu1 %1346 }
 0x529   :  { %v1344_v50 = vpop.xlane.xlu0 %1343 }
 0x52c   :  { %v1353_v14 = vpop.xlane.xlu1 %1352 }
 0x52d   :  { %v1350_v17 = vpop.xlane.xlu0 %1349 }
 0x530   :  { %v1359_v43 = vpop.xlane.xlu1 %1358 }
 0x564   :  { %v2374_v25 = vpop.f32.mrf.mxu0 }
 0x565   :  { %v1373_v56 = vadd.f32 %v2374_v25, %v1329_v48  ;;  %v2600_v25 = vld [vmem:[%s3597_s1 + $0x38] sm:$0xff] }
 0x566   :  { %v1212_v33 = vpop.f32.mrf.mxu0 }
 0x567   :  { %vm1389_vm4 = vcmp.gt.f32.partialorder %v1373_v56, 0.0  ;;  %v1405_v58 = vmul.f32 0.2, %v1373_v56  ;;  %v1372_v42 = vadd.f32 %v1326_v2, %v1212_v33 }
 0x568   :  { %v2377_v49 = vpop.f32.mrf.mxu0 }
 0x569   :  { %vm1388_vm5 = vcmp.gt.f32.partialorder %v1372_v42, 0.0  ;;  %v1404_v54 = vmul.f32 0.2, %v1372_v42  ;;  %v1375_v62 = vadd.f32 %v2377_v49, %v1335_v10  ;;  %v1421_v0 = vsel %vm1389_vm4, %v1373_v56, %v1405_v58 }
 0x56a   :  { %v1222_v1 = vpop.f32.mrf.mxu0  ;;  %v3317_v57 = vadd.f32 %v2594_v63, %v1421_v0  ;;  %v1365_v63 = vpop.xlane.xlu1 %1364 }
 0x56b   :  { %vm1391_vm6 = vcmp.gt.f32.partialorder %v1375_v62, 0.0  ;;  %v1407_v3 = vmul.f32 0.2, %v1375_v62  ;;  %v1374_v6 = vadd.f32 %v1332_v53, %v1222_v1  ;;  %v1420_v60 = vsel %vm1388_vm5, %v1372_v42, %v1404_v54  ;;  %v1356_v53 = vpop.xlane.xlu0 %1355  ;;  %v2601_v54 = vld [vmem:[%s3597_s1 + $0x30] sm:$0xff] }
 0x56c   :  { %v2380_v7 = vpop.f32.mrf.mxu0  ;;  %v1455_v8 = vsel %vm535_vm2, %v3317_v57, -inf  ;;  %v3324_v9 = vadd.f32 %v2595_v4, %v1420_v60  ;;  %v2602_v60 = vld [vmem:[%s3597_s1 + $0x48] sm:$0xff] }
 0x56d   :  { %vm1390_vm7 = vcmp.gt.f32.partialorder %v1374_v6, 0.0  ;;  %v1406_v11 = vmul.f32 0.2, %v1374_v6  ;;  %v1377_v5 = vadd.f32 %v2380_v7, %v1341_v18  ;;  %1456 = vmax.xlane.f32.xlu1 %v1455_v8  ;;  %v1423_v13 = vsel %vm1391_vm6, %v1375_v62, %v1407_v3 }
 0x56e   :  { %v1232_v15 = vpop.f32.mrf.mxu0  ;;  %v1452_v16 = vsel %vm535_vm2, %v3324_v9, -inf  ;;  %v3331_v19 = vadd.f32 %v2596_v12, %v1423_v13 }
 0x56f   :  { %vm1393_vm8 = vcmp.gt.f32.partialorder %v1377_v5, 0.0  ;;  %v1409_v20 = vmul.f32 0.2, %v1377_v5  ;;  %v1376_v22 = vadd.f32 %v1338_v55, %v1232_v15  ;;  %1453 = vmax.xlane.f32.xlu0 %v1452_v16  ;;  %v1422_v23 = vsel %vm1390_vm7, %v1374_v6, %v1406_v11  ;;  %v2603_v15 = vld [vmem:[%s3597_s1 + $0x40] sm:$0xff] }
 0x570   :  { %v2383_v24 = vpop.f32.mrf.mxu0  ;;  %v1461_v26 = vsel %vm535_vm2, %v3331_v19, -inf  ;;  %v3338_v21 = vadd.f32 %v2597_v27, %v1422_v23 }
 0x571   :  { %vm1392_vm9 = vcmp.gt.f32.partialorder %v1376_v22, 0.0  ;;  %v1408_v28 = vmul.f32 0.2, %v1376_v22  ;;  %v1379_v29 = vadd.f32 %v2383_v24, %v1347_v61  ;;  %1462 = vmax.xlane.f32.xlu1 %v1461_v26  ;;  %v1425_v30 = vsel %vm1393_vm8, %v1377_v5, %v1409_v20  ;;  %v1362_v5 = vpop.xlane.xlu0 %1361  ;;  %v2604_v24 = vld [vmem:[%s3597_s1 + $0x58] sm:$0xff] }
 0x572   :  { %v1242_v31 = vpop.f32.mrf.mxu0  ;;  %v1458_v32 = vsel %vm535_vm2, %v3338_v21, -inf  ;;  %v3345_v35 = vadd.f32 %v2598_v34, %v1425_v30  ;;  %v1371_v30 = vpop.xlane.xlu1 %1370  ;;  %v2605_v34 = vld [vmem:[%s3597_s1 + $0x50] sm:$0xff] }
 0x573   :  { %vm1395_vm10 = vcmp.gt.f32.partialorder %v1379_v29, 0.0  ;;  %v1411_v37 = vmul.f32 0.2, %v1379_v29  ;;  %v1378_v39 = vadd.f32 %v1344_v50, %v1242_v31  ;;  %1459 = vmax.xlane.f32.xlu0 %v1458_v32  ;;  %v1424_v36 = vsel %vm1392_vm9, %v1376_v22, %v1408_v28 }
 0x574   :  { %v2386_v41 = vpop.f32.mrf.mxu0  ;;  %v1467_v51 = vsel %vm535_vm2, %v3345_v35, -inf  ;;  %v3352_v59 = vadd.f32 %v2599_v45, %v1424_v36 }
 0x575   :  { %vm1394_vm11 = vcmp.gt.f32.partialorder %v1378_v39, 0.0  ;;  %v1410_v48 = vmul.f32 0.2, %v1378_v39  ;;  %v1381_v2 = vadd.f32 %v2386_v41, %v1353_v14  ;;  %1468 = vmax.xlane.f32.xlu1 %v1467_v51  ;;  %v1427_v10 = vsel %vm1395_vm10, %v1379_v29, %v1411_v37  ;;  %v1368_v41 = vpop.xlane.xlu0 %1367 }
 0x576   :  { %v1252_v18 = vpop.f32.mrf.mxu0  ;;  %v1464_v55 = vsel %vm535_vm2, %v3352_v59, -inf  ;;  %v3359_v56 = vadd.f32 %v2600_v25, %v1427_v10  ;;  %v2607_v25 = vld [vmem:[%s3597_s1 + $0x60] sm:$0xff] }
 0x577   :  { %vm1397_vm12 = vcmp.gt.f32.partialorder %v1381_v2, 0.0  ;;  %v1413_v33 = vmul.f32 0.2, %v1381_v2  ;;  %v1380_v58 = vadd.f32 %v1350_v17, %v1252_v18  ;;  %1465 = vmax.xlane.f32.xlu0 %v1464_v55  ;;  %v1426_v42 = vsel %vm1394_vm11, %v1378_v39, %v1410_v48  ;;  %v2606_v48 = vld [vmem:[%s3597_s1 + $0x68] sm:$0xff] }
 0x578   :  { %v2389_v61 = vpop.f32.mrf.mxu0  ;;  %v1473_v49 = vsel %vm535_vm2, %v3359_v56, -inf  ;;  %v3366_v62 = vadd.f32 %v2601_v54, %v1426_v42 }
 0x579   :  { %vm1396_vm13 = vcmp.gt.f32.partialorder %v1380_v58, 0.0  ;;  %v1412_v0 = vmul.f32 0.2, %v1380_v58  ;;  %v1383_v50 = vadd.f32 %v2389_v61, %v1359_v43  ;;  %1474 = vmax.xlane.f32.xlu1 %v1473_v49  ;;  %v1429_v1 = vsel %vm1397_vm12, %v1381_v2, %v1413_v33  ;;  %v2608_v49 = vld [vmem:[%s3597_s1 + $0x78] sm:$0xff] }
 0x57a   :  { %v1262_v3 = vpop.f32.mrf.mxu0  ;;  %v1470_v6 = vsel %vm535_vm2, %v3366_v62, -inf  ;;  %v3373_v7 = vadd.f32 %v2602_v60, %v1429_v1  ;;  %v2609_v1 = vld [vmem:[%s3597_s1 + $0x70] sm:$0xff] }
 0x57b   :  { %vm1399_vm14 = vcmp.gt.f32.partialorder %v1383_v50, 0.0  ;;  %v1415_v8 = vmul.f32 0.2, %v1383_v50  ;;  %v1382_v4 = vadd.f32 %v1356_v53, %v1262_v3  ;;  %1471 = vmax.xlane.f32.xlu0 %v1470_v6  ;;  %v1428_v11 = vsel %vm1396_vm13, %v1380_v58, %v1412_v0 }
 0x57c   :  { %v2392_v13 = vpop.f32.mrf.mxu0  ;;  %v1479_v14 = vsel %vm535_vm2, %v3373_v7, -inf  ;;  %v3380_v16 = vadd.f32 %v2603_v15, %v1428_v11 }
 0x57d   :  { %vm1398_vm15 = vcmp.gt.f32.partialorder %v1382_v4, 0.0  ;;  %v1414_v12 = vmul.f32 0.2, %v1382_v4  ;;  %v1385_v20 = vadd.f32 %v2392_v13, %v1365_v63  ;;  %1480 = vmax.xlane.f32.xlu1 %v1479_v14  ;;  %v1431_v22 = vsel %vm1399_vm14, %v1383_v50, %v1415_v8 }
 0x57e   :  { %v1272_v23 = vpop.f32.mrf.mxu0  ;;  %v1476_v17 = vsel %vm535_vm2, %v3380_v16, -inf  ;;  %v3387_v26 = vadd.f32 %v2604_v24, %v1431_v22 }
 0x57f   :  { %vm1401_vm1 = vcmp.gt.f32.partialorder %v1385_v20, 0.0  ;;  %v1417_v27 = vmul.f32 0.2, %v1385_v20  ;;  %v1384_v28 = vadd.f32 %v1362_v5, %v1272_v23  ;;  %1477 = vmax.xlane.f32.xlu0 %v1476_v17  ;;  %v1430_v29 = vsel %vm1398_vm15, %v1382_v4, %v1414_v12 }
 0x580   :  { %v2395_v31 = vpop.f32.mrf.mxu0  ;;  %v1485_v32 = vsel %vm535_vm2, %v3387_v26, -inf  ;;  %v3394_v37 = vadd.f32 %v2605_v34, %v1430_v29 }
 0x581   :  { %vm1400_vm3 = vcmp.gt.f32.partialorder %v1384_v28, 0.0  ;;  %v1416_v39 = vmul.f32 0.2, %v1384_v28  ;;  %v1387_v36 = vadd.f32 %v2395_v31, %v1371_v30  ;;  %1486 = vmax.xlane.f32.xlu1 %v1485_v32  ;;  %v1433_v43 = vsel %vm1401_vm1, %v1385_v20, %v1417_v27 }
 0x582   :  { %v1282_v51 = vpop.f32.mrf.mxu0  ;;  %v1482_v45 = vsel %vm535_vm2, %v3394_v37, -inf  ;;  %v3401_v2 = vadd.f32 %v2606_v48, %v1433_v43 }
 0x583   :  { %vm1403_vm4 = vcmp.gt.f32.partialorder %v1387_v36, 0.0  ;;  %v1419_v10 = vmul.f32 0.2, %v1387_v36  ;;  %v1386_v53 = vadd.f32 %v1368_v41, %v1282_v51  ;;  %1483 = vmax.xlane.f32.xlu0 %v1482_v45  ;;  %v1432_v18 = vsel %vm1400_vm3, %v1384_v28, %v1416_v39 }
 0x584   :  { %v1491_v55 = vsel %vm535_vm2, %v3401_v2, -inf  ;;  %v3408_v33 = vadd.f32 %v2607_v25, %v1432_v18 }
 0x585   :  { %vm1402_vm5 = vcmp.gt.f32.partialorder %v1386_v53, 0.0  ;;  %v1418_v58 = vmul.f32 0.2, %v1386_v53  ;;  %1492 = vmax.xlane.f32.xlu1 %v1491_v55  ;;  %v1435_v42 = vsel %vm1403_vm4, %v1387_v36, %v1419_v10 }
 0x586   :  { %v1488_v61 = vsel %vm535_vm2, %v3408_v33, -inf  ;;  %v3415_v54 = vadd.f32 %v2608_v49, %v1435_v42 }
 0x587   :  { %1489 = vmax.xlane.f32.xlu0 %v1488_v61  ;;  %v1434_v0 = vsel %vm1402_vm5, %v1386_v53, %v1418_v58 }
 0x588   :  { %v1497_v50 = vsel %vm535_vm2, %v3415_v54, -inf  ;;  %v3422_v63 = vadd.f32 %v2609_v1, %v1434_v0 }
 0x589   :  { %1498 = vmax.xlane.f32.xlu1 %v1497_v50 }
 0x58a   :  { %v1494_v3 = vsel %vm535_vm2, %v3422_v63, -inf }
 0x58b   :  { %1495 = vmax.xlane.f32.xlu0 %v1494_v3 }
 0x5f6   :  { %v1457_v6 = vpop.xlane.xlu1 %1456 }
 0x5f7   :  { %v1501_v60 = vsub.f32 %v3317_v57, %v1457_v6 }
 0x5f8   :  { %v1454_v8 = vpop.xlane.xlu0 %1453 }
 0x5f9   :  { %v1518_v4 = vmul.f32 1.442695, %v1501_v60  ;;  %v1500_v11 = vsub.f32 %v3324_v9, %v1454_v8 }
 0x5fa   :  { %v1463_v5 = vpop.xlane.xlu1 %1462 }
 0x5fb   :  { %2530 = vpow2.f32 %v1518_v4  ;;  %v1516_v13 = vmul.f32 1.442695, %v1500_v11  ;;  %v1503_v14 = vsub.f32 %v3331_v19, %v1463_v5 }
 0x5fc   :  { %v1460_v15 = vpop.xlane.xlu0 %1459 }
 0x5fd   :  { %2532 = vpow2.f32 %v1516_v13  ;;  %v1522_v12 = vmul.f32 1.442695, %v1503_v14  ;;  %v1502_v20 = vsub.f32 %v3338_v21, %v1460_v15 }
 0x5fe   :  { %v1469_v22 = vpop.xlane.xlu1 %1468 }
 0x5ff   :  { %2534 = vpow2.f32 %v1522_v12  ;;  %v1520_v23 = vmul.f32 1.442695, %v1502_v20  ;;  %v1505_v17 = vsub.f32 %v3345_v35, %v1469_v22 }
 0x600   :  { %v1466_v57 = vpop.xlane.xlu0 %1465 }
 0x601   :  { %2536 = vpow2.f32 %v1520_v23  ;;  %v1526_v24 = vmul.f32 1.442695, %v1505_v17  ;;  %v1504_v9 = vsub.f32 %v3352_v59, %v1466_v57 }
 0x602   :  { %v1475_v27 = vpop.xlane.xlu1 %1474 }
 0x603   :  { %2538 = vpow2.f32 %v1526_v24  ;;  %v1524_v28 = vmul.f32 1.442695, %v1504_v9  ;;  %v1507_v19 = vsub.f32 %v3359_v56, %v1475_v27 }
 0x604   :  { %v1472_v29 = vpop.xlane.xlu0 %1471 }
 0x605   :  { %2540 = vpow2.f32 %v1524_v28  ;;  %v1530_v30 = vmul.f32 1.442695, %v1507_v19  ;;  %v1506_v21 = vsub.f32 %v3366_v62, %v1472_v29 }
 0x606   :  { %v1481_v31 = vpop.xlane.xlu1 %1480 }
 0x607   :  { %2542 = vpow2.f32 %v1530_v30  ;;  %v1528_v32 = vmul.f32 1.442695, %v1506_v21  ;;  %v1509_v35 = vsub.f32 %v3373_v7, %v1481_v31 }
 0x608   :  { %v3435_v34 = vpop.eup %2530  ;;  %v1478_v39 = vpop.xlane.xlu0 %1477 }
 0x609   :  { %2544 = vpow2.f32 %v1528_v32  ;;  %v1534_v59 = vmul.f32 1.442695, %v1509_v35  ;;  %v1508_v36 = vsub.f32 %v3380_v16, %v1478_v39  ;;  %v1551_v56 = vsel %vm535_vm2, %v3435_v34, 0.0 }
 0x60a   :  { %v3440_v43 = vpop.eup %2532  ;;  %v1487_v41 = vpop.xlane.xlu1 %1486  ;;  %1552 = vadd.xlane.f32.xlu1 %v1551_v56 }
 0x60b   :  { %2546 = vpow2.f32 %v1534_v59  ;;  %v1532_v62 = vmul.f32 1.442695, %v1508_v36  ;;  %v1511_v51 = vsub.f32 %v3387_v26, %v1487_v41  ;;  %v1548_v7 = vsel %vm535_vm2, %v3440_v43, 0.0 }
 0x60c   :  { %v3445_v45 = vpop.eup %2534  ;;  %1549 = vadd.xlane.f32.xlu0 %v1548_v7  ;;  %v1484_v48 = vpop.xlane.xlu0 %1483 }
 0x60d   :  { %2548 = vpow2.f32 %v1532_v62  ;;  %v1538_v16 = vmul.f32 1.442695, %v1511_v51  ;;  %v1510_v10 = vsub.f32 %v3394_v37, %v1484_v48  ;;  %v1557_v53 = vsel %vm535_vm2, %v3445_v45, 0.0 }
 0x60e   :  { %v3450_v18 = vpop.eup %2536  ;;  %v1493_v55 = vpop.xlane.xlu1 %1492  ;;  %1558 = vadd.xlane.f32.xlu1 %v1557_v53 }
 0x60f   :  { %2550 = vpow2.f32 %v1538_v16  ;;  %v1536_v26 = vmul.f32 1.442695, %v1510_v10  ;;  %v1513_v25 = vsub.f32 %v3401_v2, %v1493_v55  ;;  %v1554_v58 = vsel %vm535_vm2, %v3450_v18, 0.0 }
 0x610   :  { %v3455_v42 = vpop.eup %2538  ;;  %1555 = vadd.xlane.f32.xlu0 %v1554_v58  ;;  %v1490_v61 = vpop.xlane.xlu0 %1489 }
 0x611   :  { %2552 = vpow2.f32 %v1536_v26  ;;  %v1542_v37 = vmul.f32 1.442695, %v1513_v25  ;;  %v1512_v49 = vsub.f32 %v3408_v33, %v1490_v61  ;;  %v1563_v0 = vsel %vm535_vm2, %v3455_v42, 0.0 }
 0x612   :  { %v3460_v50 = vpop.eup %2540  ;;  %1564 = vadd.xlane.f32.xlu1 %v1563_v0  ;;  %v1499_v1 = vpop.xlane.xlu1 %1498 }
 0x613   :  { %2554 = vpow2.f32 %v1542_v37  ;;  %v1540_v2 = vmul.f32 1.442695, %v1512_v49  ;;  %v1515_v3 = vsub.f32 %v3415_v54, %v1499_v1  ;;  %v1560_v6 = vsel %vm535_vm2, %v3460_v50, 0.0 }
 0x614   :  { %v3465_v60 = vpop.eup %2542  ;;  %1561 = vadd.xlane.f32.xlu0 %v1560_v6  ;;  %v1496_v8 = vpop.xlane.xlu0 %1495 }
 0x615   :  { %2556 = vpow2.f32 %v1540_v2  ;;  %v1546_v33 = vmul.f32 1.442695, %v1515_v3  ;;  %v1514_v4 = vsub.f32 %v3422_v63, %v1496_v8  ;;  %v1569_v11 = vsel %vm535_vm2, %v3465_v60, 0.0 }
 0x616   :  { %v3470_v5 = vpop.eup %2544  ;;  %1570 = vadd.xlane.f32.xlu1 %v1569_v11 }
 0x617   :  { %2558 = vpow2.f32 %v1546_v33  ;;  %v1544_v13 = vmul.f32 1.442695, %v1514_v4  ;;  %v1566_v54 = vsel %vm535_vm2, %v3470_v5, 0.0 }
 0x618   :  { %v3474_v14 = vpop.eup %2546  ;;  %1567 = vadd.xlane.f32.xlu0 %v1566_v54 }
 0x619   :  { %2560 = vpow2.f32 %v1544_v13  ;;  %v1575_v15 = vsel %vm535_vm2, %v3474_v14, 0.0 }
 0x61a   :  { %v3478_v12 = vpop.eup %2548  ;;  %1576 = vadd.xlane.f32.xlu1 %v1575_v15 }
 0x61b   :  { %v1572_v63 = vsel %vm535_vm2, %v3478_v12, 0.0 }
 0x61c   :  { %v3482_v20 = vpop.eup %2550  ;;  %1573 = vadd.xlane.f32.xlu0 %v1572_v63 }
 0x61d   :  { %v1581_v22 = vsel %vm535_vm2, %v3482_v20, 0.0 }
 0x61e   :  { %v3486_v23 = vpop.eup %2552  ;;  %1582 = vadd.xlane.f32.xlu1 %v1581_v22 }
 0x61f   :  { %v1578_v17 = vsel %vm535_vm2, %v3486_v23, 0.0 }
 0x620   :  { %v3490_v57 = vpop.eup %2554  ;;  %1579 = vadd.xlane.f32.xlu0 %v1578_v17  ;;  %v1883_v17 = vld [vmem:[%s3599_s5 + $0x30] sm:$0xff] }
 0x621   :  { %v1587_v24 = vsel %vm535_vm2, %v3490_v57, 0.0 }
 0x622   :  { %v3494_v9 = vpop.eup %2556  ;;  %1588 = vadd.xlane.f32.xlu1 %v1587_v24  ;;  %v1881_v24 = vld [vmem:[%s3599_s5 + $0x20] sm:$0xff] }
 0x623   :  { %v1584_v27 = vsel %vm535_vm2, %v3494_v9, 0.0 }
 0x624   :  { %v3498_v28 = vpop.eup %2558  ;;  %1585 = vadd.xlane.f32.xlu0 %v1584_v27  ;;  %v1879_v27 = vld [vmem:[%s3599_s5 + $0x10] sm:$0xff] }
 0x625   :  { %v1593_v19 = vsel %vm535_vm2, %v3498_v28, 0.0 }
 0x626   :  { %v3502_v29 = vpop.eup %2560  ;;  %1594 = vadd.xlane.f32.xlu1 %v1593_v19  ;;  %v1877_v19 = vld [vmem:[%s3599_s5] sm:$0xff] }
 0x627   :  { %v1590_v30 = vsel %vm535_vm2, %v3502_v29, 0.0 }
 0x628   :  { %1591 = vadd.xlane.f32.xlu0 %v1590_v30 }
 0x693   :  { %v1553_v21 = vpop.xlane.xlu1 %1552 }
 0x694   :  { %2562 = vrcp.f32 %v1553_v21 }
 0x695   :  { %v1550_v31 = vpop.xlane.xlu0 %1549 }
 0x696   :  { %2564 = vrcp.f32 %v1550_v31 }
 0x697   :  { %v1559_v32 = vpop.xlane.xlu1 %1558 }
 0x698   :  { %2566 = vrcp.f32 %v1559_v32 }
 0x699   :  { %v1556_v35 = vpop.xlane.xlu0 %1555 }
 0x69a   :  { %2568 = vrcp.f32 %v1556_v35 }
 0x69b   :  { %v1565_v39 = vpop.xlane.xlu1 %1564 }
 0x69c   :  { %2570 = vrcp.f32 %v1565_v39  ;;  %v2054_v39 = vld [vmem:[%s3598_s4 + $0x8] sm:$0x1f] }
 0x69d   :  { %v1562_v59 = vpop.xlane.xlu0 %1561 }
 0x69e   :  { %2572 = vrcp.f32 %v1562_v59 }
 0x69f   :  { %v1571_v36 = vpop.xlane.xlu1 %1570 }
 0x6a0   :  { %2574 = vrcp.f32 %v1571_v36  ;;  %v1824_v36 = vrot.slane %v2054_v39, %v907_v40  ;;  %v1864_v40 = vrot.slane %v2054_v39, %v947_v52 }
 0x6a1   :  { %v1568_v56 = vpop.xlane.xlu0 %1567  ;;  %v2563_v41 = vpop.eup %2562 }
 0x6a2   :  { %2576 = vrcp.f32 %v1568_v56  ;;  %v1613_v48 = vmul.f32 %v2563_v41, %v3435_v34  ;;  %v1840_v41 = vrot.slane %v2054_v39, %v923_v44 }
 0x6a3   :  { %v2565_v62 = vpop.eup %2564  ;;  %v1577_v51 = vpop.xlane.xlu1 %1576 }
 0x6a4   :  { %v1612_v7 = vmul.f32 %v2565_v62, %v3440_v43  ;;  %2578 = vrcp.f32 %v1577_v51 }
 0x6a5   :  { %v1574_v16 = vpop.xlane.xlu0 %1573  ;;  %v2567_v10 = vpop.eup %2566 }
 0x6a6   :  { %2580 = vrcp.f32 %v1574_v16  ;;  %2404 = vmatprep.mubr.msk.f32.mxu1 %vm535_vm2, %v1612_v7  ;;  %v1615_v58 = vmul.f32 %v2567_v10, %v3445_v45  ;;  %v1832_v7 = vrot.slane %v2054_v39, %v915_v46 }
 0x6a7   :  { %v2569_v53 = vpop.eup %2568  ;;  %v1583_v55 = vpop.xlane.xlu1 %1582  ;;  %2405 = vmatmul.mubr.msk.f32.vlgmr.msra.gmra.mxu1 %vm535_vm2, %v1613_v48  ;;  %v1852_v48 = vrot.slane %v2054_v39, %v935_v47 }
 0x6a8   :  { %v1614_v26 = vmul.f32 %v2569_v53, %v3450_v18  ;;  %2582 = vrcp.f32 %v1583_v55 }
 0x6a9   :  { %v1580_v25 = vpop.xlane.xlu0 %1579  ;;  %v2571_v61 = vpop.eup %2570 }
 0x6aa   :  { %2584 = vrcp.f32 %v1580_v25  ;;  %2407 = vmatprep.mubr.msk.f32.mxu1 %vm535_vm2, %v1614_v26  ;;  %v1617_v0 = vmul.f32 %v2571_v61, %v3455_v42 }
 0x6ab   :  { %v2573_v34 = vpop.eup %2572  ;;  %v1589_v43 = vpop.xlane.xlu1 %1588  ;;  %2408 = vmatmul.mubr.msk.f32.gmra.mxu1 %vm535_vm2, %v1615_v58 }
 0x6ac   :  { %v1616_v37 = vmul.f32 %v2573_v34, %v3460_v50  ;;  %2586 = vrcp.f32 %v1589_v43 }
 0x6ad   :  { %v1586_v49 = vpop.xlane.xlu0 %1585  ;;  %v2575_v1 = vpop.eup %2574 }
 0x6ae   :  { %2588 = vrcp.f32 %v1586_v49  ;;  %2410 = vmatprep.mubr.msk.f32.mxu1 %vm535_vm2, %v1616_v37  ;;  %v1619_v6 = vmul.f32 %v2575_v1, %v3465_v60 }
 0x6af   :  { %v2577_v18 = vpop.eup %2576  ;;  %v1595_v45 = vpop.xlane.xlu1 %1594  ;;  %2411 = vmatmul.mubr.msk.f32.gmra.mxu1 %vm535_vm2, %v1617_v0 }
 0x6b0   :  { %v1618_v2 = vmul.f32 %v2577_v18, %v3470_v5  ;;  %2590 = vrcp.f32 %v1595_v45 }
 0x6b1   :  { %v1592_v3 = vpop.xlane.xlu0 %1591  ;;  %v2579_v8 = vpop.eup %2578 }
 0x6b2   :  { %2592 = vrcp.f32 %v1592_v3  ;;  %2413 = vmatprep.mubr.msk.f32.mxu1 %vm535_vm2, %v1618_v2  ;;  %v1621_v33 = vmul.f32 %v2579_v8, %v3474_v14 }
 0x6b3   :  { %v2581_v50 = vpop.eup %2580  ;;  %2414 = vmatmul.mubr.msk.f32.gmra.mxu1 %vm535_vm2, %v1619_v6 }
 0x6b4   :  { %v1620_v42 = vmul.f32 %v2581_v50, %v3478_v12 }
 0x6b5   :  { %v2583_v4 = vpop.eup %2582 }
 0x6b6   :  { %2416 = vmatprep.mubr.msk.f32.mxu1 %vm535_vm2, %v1620_v42  ;;  %v1623_v60 = vmul.f32 %v2583_v4, %v3482_v20 }
 0x6b7   :  { %v2585_v11 = vpop.eup %2584  ;;  %2417 = vmatmul.mubr.msk.f32.gmra.mxu1 %vm535_vm2, %v1621_v33 }
 0x6b8   :  { %v1622_v5 = vmul.f32 %v2585_v11, %v3486_v23  ;;  %v1884_v23 = vld [vmem:[%s3599_s5 + $0x38] sm:$0xff] }
 0x6b9   :  { %v2587_v13 = vpop.eup %2586  ;;  %2428 = vmatprep.subr.mxu0 %v1884_v23  ;;  %2450 = vmatprep.subr.mxu1 %v1884_v23 }
 0x6ba   :  { %2419 = vmatprep.mubr.msk.f32.mxu1 %vm535_vm2, %v1622_v5  ;;  %v1625_v14 = vmul.f32 %v2587_v13, %v3490_v57  ;;  %2429 = vmatpush3.msra.mxu0 %v1884_v23  ;;  %v1882_v57 = vld [vmem:[%s3599_s5 + $0x28] sm:$0xff] }
 0x6bb   :  { %v2589_v54 = vpop.eup %2588  ;;  %2420 = vmatmul.mubr.msk.f32.gmra.mxu1 %vm535_vm2, %v1623_v60  ;;  %2430 = vmatprep.subr.mxu0 %v1883_v17 }
 0x6bc   :  { %v1624_v15 = vmul.f32 %v2589_v54, %v3494_v9  ;;  %2458 = vmatpush3.msra.mxu1 %v1884_v23  ;;  %2431 = vmatpush3.msra.mxu0 %v1883_v17  ;;  %v1880_v9 = vld [vmem:[%s3599_s5 + $0x18] sm:$0xff] }
 0x6bd   :  { %v2591_v12 = vpop.eup %2590  ;;  %2451 = vmatprep.subr.mxu1 %v1883_v17  ;;  %2432 = vmatprep.subr.mxu0 %v1882_v57 }
 0x6be   :  { %2422 = vmatprep.mubr.msk.f32.mxu1 %vm535_vm2, %v1624_v15  ;;  %v1627_v20 = vmul.f32 %v2591_v12, %v3498_v28  ;;  %2459 = vmatpush3.msra.mxu1 %v1883_v17  ;;  %v1878_v28 = vld [vmem:[%s3599_s5 + $0x8] sm:$0xff] }
 0x6bf   :  { %v2593_v63 = vpop.eup %2592  ;;  %2423 = vmatmul.mubr.msk.f32.gmra.mxu1 %vm535_vm2, %v1625_v14  ;;  %2452 = vmatprep.subr.mxu1 %v1882_v57 }
 0x6c0   :  { %v1626_v22 = vmul.f32 %v2593_v63, %v3502_v29  ;;  %2433 = vmatpush3.msra.mxu0 %v1882_v57  ;;  %2460 = vmatpush3.msra.mxu1 %v1882_v57  ;;  %v2135_v57 = vld [vmem:[%s3600_s6] ss:$0 sm:$0xff] }
 0x6c1   :  { %2434 = vmatprep.subr.mxu0 %v1881_v24  ;;  %2453 = vmatprep.subr.mxu1 %v1881_v24 }
 0x6c2   :  { %2425 = vmatprep.mubr.msk.f32.mxu1 %vm535_vm2, %v1626_v22  ;;  %2435 = vmatpush3.msra.mxu0 %v1881_v24 }
 0x6c3   :  { %2426 = vmatmul.mubr.msk.f32.gmra.mxu1 %vm535_vm2, %v1627_v20  ;;  %2436 = vmatprep.subr.mxu0 %v1880_v9  ;;  %vm1989_vm2 = vcmask 64512  }
 0x6c4   :  { %2461 = vmatpush3.msra.mxu1 %v1881_v24  ;;  %2437 = vmatpush3.msra.mxu0 %v1880_v9 }
 0x6c5   :  { %2454 = vmatprep.subr.mxu1 %v1880_v9  ;;  %2438 = vmatprep.subr.mxu0 %v1879_v27 }
 0x6c6   :  { %2462 = vmatpush3.msra.mxu1 %v1880_v9  ;;  %2439 = vmatpush3.msra.mxu0 %v1879_v27 }
 0x6c7   :  { %2455 = vmatprep.subr.mxu1 %v1879_v27  ;;  %2440 = vmatprep.subr.mxu0 %v1878_v28 }
 0x6c8   :  { %2463 = vmatpush3.msra.mxu1 %v1879_v27  ;;  %2441 = vmatpush3.msra.mxu0 %v1878_v28 }
 0x6c9   :  { %2456 = vmatprep.subr.mxu1 %v1878_v28  ;;  %2442 = vmatprep.subr.mxu0 %v1877_v19 }
 0x6ca   :  { %2464 = vmatpush3.msra.mxu1 %v1878_v28  ;;  %2443 = vmatpush3.msra.mxu0 %v1877_v19 }
 0x6cb   :  { %2457 = vmatprep.subr.mxu1 %v1877_v19 }
 0x6cc   :  { %2465 = vmatpush3.msra.mxu1 %v1877_v19 }
 0x767   :  { %v2406_v29 = vpop.f32.mrf.mxu1 }
 0x768   :  { %v1826_v51 = vmul.f32 %v2406_v29, %v1824_v36 }
 0x769   :  { %v1742_v30 = vpop.f32.mrf.mxu1 }
 0x76a   :  { %v1825_v10 = vmul.f32 %v1824_v36, %v1742_v30  ;;  %v1834_v25 = vadd.f32 %v1832_v7, %v1826_v51 }
 0x76b   :  { %v2409_v21 = vpop.f32.mrf.mxu1 }
 0x76c   :  { %v1828_v58 = vmul.f32 %v2409_v21, %v1824_v36  ;;  %v1833_v34 = vadd.f32 %v1832_v7, %v1825_v10 }
 0x76d   :  { %v1752_v31 = vpop.f32.mrf.mxu1 }
 0x76e   :  { %v1827_v43 = vmul.f32 %v1824_v36, %v1752_v31  ;;  %v1836_v45 = vadd.f32 %v1832_v7, %v1828_v58 }
 0x76f   :  { %v2412_v32 = vpop.f32.mrf.mxu1 }
 0x770   :  { %v1842_v53 = vmul.f32 %v2412_v32, %v1840_v41  ;;  %v1835_v8 = vadd.f32 %v1832_v7, %v1827_v43 }
 0x771   :  { %v1762_v35 = vpop.f32.mrf.mxu1 }
 0x772   :  { %v1841_v26 = vmul.f32 %v1840_v41, %v1762_v35  ;;  %v1846_v49 = vadd.f32 %v1842_v53, %v1834_v25 }
 0x773   :  { %v2415_v59 = vpop.f32.mrf.mxu1 }
 0x774   :  { %v1844_v46 = vmul.f32 %v2415_v59, %v1840_v41  ;;  %v1845_v1 = vadd.f32 %v1841_v26, %v1833_v34 }
 0x775   :  { %v1772_v56 = vpop.f32.mrf.mxu1 }
 0x776   :  { %v1843_v47 = vmul.f32 %v1840_v41, %v1772_v56  ;;  %v1848_v42 = vadd.f32 %v1844_v46, %v1836_v45 }
 0x777   :  { %v2418_v62 = vpop.f32.mrf.mxu1 }
 0x778   :  { %v1854_v61 = vmul.f32 %v2418_v62, %v1852_v48  ;;  %v1847_v11 = vadd.f32 %v1843_v47, %v1835_v8 }
 0x779   :  { %v1782_v16 = vpop.f32.mrf.mxu1 }
 0x77a   :  { %v1853_v37 = vmul.f32 %v1852_v48, %v1782_v16  ;;  %v1858_v2 = vadd.f32 %v1854_v61, %v1846_v49 }
 0x77b   :  { %v2421_v55 = vpop.f32.mrf.mxu1 }
 0x77c   :  { %v1856_v3 = vmul.f32 %v2421_v55, %v1852_v48  ;;  %v1857_v38 = vadd.f32 %v1853_v37, %v1845_v1 }
 0x77d   :  { %v1792_v44 = vpop.f32.mrf.mxu1 }
 0x77e   :  { %v1855_v52 = vmul.f32 %v1852_v48, %v1792_v44  ;;  %v1860_v13 = vadd.f32 %v1856_v3, %v1848_v42 }
 0x77f   :  { %v2424_v0 = vpop.f32.mrf.mxu1 }
 0x780   :  { %v1866_v18 = vmul.f32 %v2424_v0, %v1864_v40  ;;  %v1859_v15 = vadd.f32 %v1855_v52, %v1847_v11 }
 0x781   :  { %v1802_v6 = vpop.f32.mrf.mxu1 }
 0x782   :  { %v1865_v50 = vmul.f32 %v1864_v40, %v1802_v6  ;;  %v1870_v33 = vadd.f32 %v1866_v18, %v1858_v2 }
 0x783   :  { %v2427_v4 = vpop.f32.mrf.mxu1 }
 0x784   :  { %v1869_v5 = vadd.f32 %v1865_v50, %v1857_v38  ;;  %v1868_v60 = vmul.f32 %v2427_v4, %v1864_v40  ;;  %v1874_v63 = vmax.f32 %v1870_v33, 0.0 }
 0x785   :  { %v1812_v54 = vpop.f32.mrf.mxu1 }
 0x786   :  { %v1873_v14 = vmax.f32 %v1869_v5, 0.0  ;;  %v1867_v12 = vmul.f32 %v1864_v40, %v1812_v54  ;;  %v1872_v22 = vadd.f32 %v1868_v60, %v1860_v13 }
 0x788   :  { %v1871_v20 = vadd.f32 %v1867_v12, %v1859_v15  ;;  %2444 = vmatprep.mubr.msk.f32.mxu0 %vm55_vm0, %v1873_v14  ;;  %v1876_v17 = vmax.f32 %v1872_v22, 0.0 }
 0x789   :  { %2445 = vmatmul.mubr.msk.f32.vlgmr.msra.gmra.mxu0 %vm55_vm0, %v1874_v63 }
 0x78a   :  { %v1875_v23 = vmax.f32 %v1871_v20, 0.0 }
 0x78c   :  { %2447 = vmatprep.mubr.msk.f32.mxu1 %vm55_vm0, %v1875_v23 }
 0x78d   :  { %2448 = vmatmul.mubr.msk.f32.vlgmr.msra.gmra.mxu1 %vm55_vm0, %v1876_v17 }
 0x849   :  { %v2446_v24 = vpop.f32.mrf.mxu0 }
 0x84a   :  { %v1976_v9 = vadd.f32 %v2446_v24, %v2135_v57 }
 0x84b   :  { %v1970_v27 = vpop.f32.mrf.mxu0 }
 0x84c   :  { %1991 = vst.msk [vmem:[%s3601_s7 + $0x8] sm:$0xff] %vm1989_vm2, %v1976_v9  ;;  %v1971_v28 = vadd.f32 %v2135_v57, %v1970_v27 }
 0x84d   :  { %v2449_v19 = vpop.f32.mrf.mxu1 }
 0x84e   :  { %1990 = vst.msk [vmem:[%s3601_s7] sm:$0xff] %vm1989_vm2, %v1971_v28  ;;  %v1986_v29 = vadd.f32 %v2449_v19, %v2135_v57 }
 0x84f   :  { %v1980_v30 = vpop.f32.mrf.mxu1 }
 0x850   :  { %1993 = vst.msk [vmem:[%s3601_s7 + $0x18] sm:$0xff] %vm1989_vm2, %v1986_v29  ;;  %v1981_v21 = vadd.f32 %v2135_v57, %v1980_v30 }
 0x852   :  { %1992 = vst.msk [vmem:[%s3601_s7 + $0x10] sm:$0xff] %vm1989_vm2, %v1981_v21 }

</bundles_post_ra>
